<compile_context>
chip_gen: v7x
topology: tpu7x:2x2x1
jax: 0.10.0
libtpu: 0.0.40
codegen_flags: <defaults>
</compile_context>

<pallas_src>
import math
import functools

import jax
import jax.numpy as jnp
from jax.experimental import pallas as pl
from jax.experimental.pallas import tpu as pltpu


NEG_INF = -1e9


# ------------------------- generation-aware budgets --------------------------

@functools.lru_cache(maxsize=None)
def _tpu_vmem_bytes():
    try:
        return int(pltpu.get_tpu_info().vmem_capacity_bytes)
    except Exception:
        return None          # unknown generation -> use conservative defaults


def _vmem_limit_bytes():
    cap = _tpu_vmem_bytes()
    if cap is None:
        return None          # let the compiler use its default scoped limit
    return int(cap * 3 // 4)  # ~48 MiB on v7x, ~96 MiB on v5e/v6e


def _max_tiles():
    """(light_kernel_max_tile, heavy_kernel_max_tile) rows per grid step."""
    cap = _tpu_vmem_bytes()
    big = cap is not None and cap >= 96 * 1024 * 1024   # 128-MiB parts (v5e/v6e)
    return (1024, 512) if big else (512, 256)            # conservative on v7x / unknown


def _compiler_params(n_grid_dims):
    return pltpu.CompilerParams(
        dimension_semantics=("parallel",) * n_grid_dims,
        vmem_limit_bytes=_vmem_limit_bytes(),
    )


def _seq_tile(S, max_tile):
    """Largest divisor of S that is <= max_tile and a multiple of 16 (then 8)."""
    if S <= max_tile:
        return S
    for step in (16, 8):
        t = (max_tile // step) * step
        while t >= step:
            if S % t == 0:
                return t
            t -= step
    # TODO(synk): pathological S (no small multiple-of-8 divisor): fall back to full S.
    return S


# ----------------------------- in-kernel helpers ----------------------------

def _layer_norm_f32(x, a, b, eps=1e-6):
    # torch ref: a * (x - mean) / (x.std(-1, unbiased=True) + eps) + b  (stats in f32)
    mean = jnp.mean(x, axis=-1, keepdims=True)
    d = x - mean
    var = jnp.sum(d * d, axis=-1, keepdims=True) / (x.shape[-1] - 1)
    return a * d / (jnp.sqrt(var) + eps) + b          # exact division (matches reference)


# ------------------------ kernel A: LN1 + fused QKV --------------------------

def ln_qkv_kernel(x_ref, ln_a_ref, ln_b_ref, w_ref, b_ref, q_ref, k_ref, v_ref):
    D = x_ref.shape[-1]
    xn = _layer_norm_f32(x_ref[0], ln_a_ref[...], ln_b_ref[...])       # f32 (TS, D)
    xb = xn.astype(jnp.bfloat16)                                       # bf16 into the MXU
    qkv = jnp.dot(xb, w_ref[...], preferred_element_type=jnp.float32) + b_ref[...]
    q_ref[0] = qkv[:, :D].astype(jnp.bfloat16)                         # q already scaled
    k_ref[0] = qkv[:, D:2 * D].astype(jnp.bfloat16)
    v_ref[0] = qkv[:, 2 * D:].astype(jnp.bfloat16)


def ln_qkv(x, p, ts):
    B, S, D = x.shape
    D3 = p["w_qkv"].shape[1]
    nS = S // ts
    full = lambda shape: pl.BlockSpec(shape, lambda b, s: (0, 0))
    tile = pl.BlockSpec((1, ts, D), lambda b, s: (b, s, 0))
    return pl.pallas_call(
        ln_qkv_kernel,
        grid=(B, nS),
        in_specs=[
            tile,                              # x (residual, f32)
            full((1, D)), full((1, D)),        # ln1 a, b
            full((D, D3)), full((1, D3)),      # fused w_qkv, b_qkv
        ],
        out_specs=(tile, tile, tile),
        out_shape=tuple(jax.ShapeDtypeStruct((B, S, D), jnp.bfloat16) for _ in range(3)),
        compiler_params=_compiler_params(2),
    )(x, p["ln1_a"], p["ln1_b"], p["w_qkv"], p["b_qkv"])


# --------------------- kernel B: attention (all heads/step) ------------------

def attention_kernel(bias_ref, q_ref, k_ref, v_ref, o_ref, *, num_heads):
    # One (batch, query-tile) per grid step; all heads + all keys per step so the
    # context store is a single lane-dense (TQ, D) write.
    # TODO(synk): for very long S add a key-tile grid axis with online-softmax accumulators.
    q = q_ref[0]                                   # (TQ, D) bf16, scale already folded in
    k = k_ref[0]                                   # (S,  D) bf16
    v = v_ref[0]                                   # (S,  D) bf16
    bias = bias_ref[0]                             # (1,  S) f32 additive mask
    dh = q.shape[-1] // num_heads
    ctx_parts = []
    for h in range(num_heads):                     # static unrolled head loop, lane slices
        sl = slice(h * dh, (h + 1) * dh)
        s = jnp.einsum('qd,kd->qk', q[:, sl], k[:, sl],
                       preferred_element_type=jnp.float32)             # f32 (TQ, S)
        s = s + bias
        s = s - jnp.max(s, axis=-1, keepdims=True)
        pexp = jnp.exp(s)
        pexp = pexp * pl.reciprocal(jnp.sum(pexp, axis=-1, keepdims=True), approx=True)
        ctx_parts.append(jnp.dot(pexp.astype(jnp.bfloat16), v[:, sl],
                                 preferred_element_type=jnp.float32))
    o_ref[0] = jnp.concatenate(ctx_parts, axis=-1).astype(o_ref.dtype)  # single (TQ, D) store


def attention(q, k, v, attn_bias, *, num_heads, tq):
    B, S, D = q.shape
    nQ = S // tq
    return pl.pallas_call(
        functools.partial(attention_kernel, num_heads=num_heads),
        grid=(B, nQ),
        in_specs=[
            pl.BlockSpec((1, 1, S), lambda b, qi: (b, 0, 0)),    # additive mask
            pl.BlockSpec((1, tq, D), lambda b, qi: (b, qi, 0)),  # q tile (all heads)
            pl.BlockSpec((1, S, D), lambda b, qi: (b, 0, 0)),    # k (all keys, all heads)
            pl.BlockSpec((1, S, D), lambda b, qi: (b, 0, 0)),    # v
        ],
        out_specs=pl.BlockSpec((1, tq, D), lambda b, qi: (b, qi, 0)),
        out_shape=jax.ShapeDtypeStruct((B, S, D), jnp.bfloat16),
        compiler_params=_compiler_params(2),
    )(attn_bias, q, k, v)


# -------------- kernel C: out-proj + residual + LN2 + FFN + residual ---------

def out_ffn_kernel(x_ref, ctx_ref,
                   wo_ref, bo_ref, ln2a_ref, ln2b_ref,
                   w1_ref, b1_ref, w2_ref, b2_ref, o_ref):
    x = x_ref[0]                                                       # f32 residual (TS, D)
    proj = jnp.dot(ctx_ref[0], wo_ref[...],
                   preferred_element_type=jnp.float32) + bo_ref[...]
    x = x + proj                                                       # residual 1
    xn = _layer_norm_f32(x, ln2a_ref[...], ln2b_ref[...])
    h = jnp.dot(xn.astype(jnp.bfloat16), w1_ref[...],
                preferred_element_type=jnp.float32) + b1_ref[...]
    h = jnp.maximum(h, 0.0)
    ff = jnp.dot(h.astype(jnp.bfloat16), w2_ref[...],
                 preferred_element_type=jnp.float32) + b2_ref[...]
    o_ref[0] = x + ff                                                  # residual 2


def out_proj_ffn(x, ctx, p, ts):
    B, S, D = x.shape
    Dff = p["w1"].shape[1]
    nS = S // ts
    full = lambda shape: pl.BlockSpec(shape, lambda b, s: (0, 0))
    tile = pl.BlockSpec((1, ts, D), lambda b, s: (b, s, 0))
    return pl.pallas_call(
        out_ffn_kernel,
        grid=(B, nS),
        in_specs=[
            tile, tile,                          # x (residual f32), ctx (bf16)
            full((D, D)), full((1, D)),          # wo, bo
            full((1, D)), full((1, D)),          # ln2 a, b
            full((D, Dff)), full((1, Dff)),      # w1, b1
            full((Dff, D)), full((1, D)),        # w2, b2
        ],
        out_specs=tile,
        out_shape=jax.ShapeDtypeStruct((B, S, D), jnp.float32),
        input_output_aliases={0: 0},             # update residual stream in place
        compiler_params=_compiler_params(2),
    )(x, ctx, p["wo"], p["bo"], p["ln2_a"], p["ln2_b"],
      p["w1"], p["b1"], p["w2"], p["b2"])


# ------------------------------ final layer norm -----------------------------

def final_ln_kernel(x_ref, a_ref, b_ref, o_ref):
    o_ref[0] = _layer_norm_f32(x_ref[0], a_ref[...], b_ref[...])


def final_layer_norm(x, a, b, ts):
    B, S, D = x.shape
    nS = S // ts
    tile = pl.BlockSpec((1, ts, D), lambda b, s: (b, s, 0))
    return pl.pallas_call(
        final_ln_kernel,
        grid=(B, nS),
        in_specs=[tile,
                  pl.BlockSpec((1, D), lambda b, s: (0, 0)),
                  pl.BlockSpec((1, D), lambda b, s: (0, 0))],
        out_specs=tile,
        out_shape=jax.ShapeDtypeStruct((B, S, D), jnp.float32),
        compiler_params=_compiler_params(2),
    )(x, a, b)


# ------------------------------- glue: embedding -----------------------------
# Embedding gather + sinusoidal PE; no matmul hot path, kept in plain JAX (inside jit).

def sinusoidal_pe(seq, d):
    assert d % 2 == 0, "sinusoidal PE requires even model dimension"
    pos = jnp.arange(seq, dtype=jnp.float32)[:, None]
    div = jnp.exp(jnp.arange(0, d, 2, dtype=jnp.float32) * (-math.log(10000.0) / d))
    pe = jnp.zeros((seq, d), jnp.float32)
    pe = pe.at[:, 0::2].set(jnp.sin(pos * div))
    pe = pe.at[:, 1::2].set(jnp.cos(pos * div))
    return pe


def embed(tokens, emb_table):
    D = emb_table.shape[1]
    x = jnp.take(emb_table, tokens, axis=0) * jnp.sqrt(jnp.float32(D))
    return x + sinusoidal_pe(tokens.shape[1], D)[None, :, :]


# ------------------------------- full forward --------------------------------

def encoder_layer(x, attn_bias, p, *, num_heads, ts_light, ts_heavy):
    q, k, v = ln_qkv(x, p, ts_light)                                  # (B,S,D) bf16, no transposes
    ctx = attention(q, k, v, attn_bias, num_heads=num_heads, tq=ts_light)
    return out_proj_ffn(x, ctx, p, ts_heavy)


@functools.partial(jax.jit, static_argnames=("num_heads",))
def bert_forward(tokens, src_mask, emb_table, layer_params, final_a, final_b, *, num_heads):
    x = embed(tokens, emb_table)
    B, S, D = x.shape
    assert D % num_heads == 0
    max_light, max_heavy = _max_tiles()
    ts_light = _seq_tile(S, max_light)
    ts_heavy = _seq_tile(S, max_heavy)
    # Additive attention mask precomputed once: 0 where attended, -1e9 where masked.
    attn_bias = jnp.where(src_mask > 0, 0.0, NEG_INF).astype(jnp.float32)
    for p in layer_params:
        x = encoder_layer(x, attn_bias, p, num_heads=num_heads,
                          ts_light=ts_light, ts_heavy=ts_heavy)
    return final_layer_norm(x, final_a, final_b, ts_light)


# ------------------------------------ main ------------------------------------

def _init_layer(key, D, Dff, num_heads):
    ks = jax.random.split(key, 6)
    s = 0.02
    scale = 1.0 / math.sqrt(D // num_heads)     # softmax scale folded into q weight/bias
    wq = s * jax.random.normal(ks[0], (D, D), jnp.float32)
    wk = s * jax.random.normal(ks[1], (D, D), jnp.float32)
    wv = s * jax.random.normal(ks[2], (D, D), jnp.float32)
    bq = jnp.zeros((D,), jnp.float32)
    bk = jnp.zeros((D,), jnp.float32)
    bv = jnp.zeros((D,), jnp.float32)
    w_qkv = jnp.concatenate([wq * scale, wk, wv], axis=1).astype(jnp.bfloat16)   # (D, 3D)
    b_qkv = jnp.concatenate([bq * scale, bk, bv])[None, :]                       # (1, 3D) f32
    w = lambda k, shape: (s * jax.random.normal(k, shape, jnp.float32)).astype(jnp.bfloat16)
    return {
        "w_qkv": w_qkv, "b_qkv": b_qkv,
        "wo": w(ks[3], (D, D)), "bo": jnp.zeros((1, D), jnp.float32),
        "ln1_a": jnp.ones((1, D), jnp.float32), "ln1_b": jnp.zeros((1, D), jnp.float32),
        "ln2_a": jnp.ones((1, D), jnp.float32), "ln2_b": jnp.zeros((1, D), jnp.float32),
        "w1": w(ks[4], (D, Dff)), "b1": jnp.zeros((1, Dff), jnp.float32),
        "w2": w(ks[5], (Dff, D)), "b2": jnp.zeros((1, D), jnp.float32),
    }


if __name__ == "__main__":
    B, S, D, H, Dff, V, L = 2, 8, 32, 4, 64, 50, 2

    key = jax.random.PRNGKey(0)
    k_emb, k_tok, *k_layers = jax.random.split(key, 2 + L)

    emb_table = 0.02 * jax.random.normal(k_emb, (V, D), jnp.float32)
    layer_params = [_init_layer(k, D, Dff, H) for k in k_layers]
    final_a = jnp.ones((1, D), jnp.float32)
    final_b = jnp.zeros((1, D), jnp.float32)

    tokens = jax.random.randint(k_tok, (B, S), 0, V, dtype=jnp.int32)
    src_mask = jnp.ones((B, 1, S), jnp.float32)
    src_mask = src_mask.at[1, 0, 6:].set(0.0)   # pretend last 2 tokens of batch 1 are padding

    out = bert_forward(tokens, src_mask, emb_table, layer_params, final_a, final_b,
                       num_heads=H)
    jax.block_until_ready(out)
    assert out.shape == (B, S, D) and out.dtype == jnp.float32
    # TODO(synk): self.generator is unused in Bert.forward, so it is not implemented here.
    print("KERNEL_OK")
</pallas_src>

<mosaic_0001>
module attributes {stable_mosaic.version = 11 : i64} {
  func.func @ln_qkv_kernel(%arg0: i32, %arg1: i32, %arg2: memref<1x8x32xf32, #tpu.memory_space<vmem>>, %arg3: memref<1x32xf32, #tpu.memory_space<vmem>>, %arg4: memref<1x32xf32, #tpu.memory_space<vmem>>, %arg5: memref<32x96xbf16, #tpu.memory_space<vmem>>, %arg6: memref<1x96xf32, #tpu.memory_space<vmem>>, %arg7: memref<1x8x32xbf16, #tpu.memory_space<vmem>>, %arg8: memref<1x8x32xbf16, #tpu.memory_space<vmem>>, %arg9: memref<1x8x32xbf16, #tpu.memory_space<vmem>>) attributes {dimension_semantics = [#tpu.dimension_semantics<parallel>, #tpu.dimension_semantics<parallel>], iteration_bounds = array<i64: 2, 1>, scalar_prefetch = 0 : i64, scratch_operands = 0 : i64, tpu.core_type = #tpu.core_type<tc>, window_params = [{transform_indices = @transform_0, window_bounds = array<i64: 1, 8, 32>}, {pipeline_mode = #tpu.pipeline_mode<synchronous>, transform_indices = @transform_1, window_bounds = array<i64: 1, 32>}, {pipeline_mode = #tpu.pipeline_mode<synchronous>, transform_indices = @transform_2, window_bounds = array<i64: 1, 32>}, {pipeline_mode = #tpu.pipeline_mode<synchronous>, transform_indices = @transform_3, window_bounds = array<i64: 32, 96>}, {pipeline_mode = #tpu.pipeline_mode<synchronous>, transform_indices = @transform_4, window_bounds = array<i64: 1, 96>}, {transform_indices = @transform_5, window_bounds = array<i64: 1, 8, 32>}, {transform_indices = @transform_6, window_bounds = array<i64: 1, 8, 32>}, {transform_indices = @transform_7, window_bounds = array<i64: 1, 8, 32>}]} {
    %c0 = arith.constant 0 : index
    %c0_0 = arith.constant 0 : index
    %c0_1 = arith.constant 0 : index
    %0 = vector.load %arg2[%c0, %c0_0, %c0_1] : memref<1x8x32xf32, #tpu.memory_space<vmem>>, vector<1x8x32xf32>
    %1 = vector.shape_cast %0 : vector<1x8x32xf32> to vector<8x32xf32>
    %c0_2 = arith.constant 0 : index
    %c0_3 = arith.constant 0 : index
    %2 = vector.load %arg3[%c0_2, %c0_3] : memref<1x32xf32, #tpu.memory_space<vmem>>, vector<1x32xf32>
    %c0_4 = arith.constant 0 : index
    %c0_5 = arith.constant 0 : index
    %3 = vector.load %arg4[%c0_4, %c0_5] : memref<1x32xf32, #tpu.memory_space<vmem>>, vector<1x32xf32>
    %cst = arith.constant dense<0.000000e+00> : vector<8xf32>
    %4 = vector.multi_reduction <add>, %1, %cst [1] : vector<8x32xf32> to vector<8xf32>
    %5 = vector.shape_cast %4 : vector<8xf32> to vector<8x1xf32>
    %cst_6 = arith.constant 3.200000e+01 : f32
    %6 = vector.broadcast %cst_6 : f32 to vector<8x1xf32>
    %7 = arith.divf %5, %6 : vector<8x1xf32>
    %8 = vector.broadcast %7 : vector<8x1xf32> to vector<8x32xf32>
    %9 = arith.subf %1, %8 : vector<8x32xf32>
    %10 = arith.mulf %9, %9 : vector<8x32xf32>
    %cst_7 = arith.constant dense<0.000000e+00> : vector<8xf32>
    %11 = vector.multi_reduction <add>, %10, %cst_7 [1] : vector<8x32xf32> to vector<8xf32>
    %12 = vector.shape_cast %11 : vector<8xf32> to vector<8x1xf32>
    %cst_8 = arith.constant 3.100000e+01 : f32
    %13 = vector.broadcast %cst_8 : f32 to vector<8x1xf32>
    %14 = arith.divf %12, %13 : vector<8x1xf32>
    %15 = vector.broadcast %2 : vector<1x32xf32> to vector<8x32xf32>
    %16 = arith.mulf %15, %9 : vector<8x32xf32>
    %17 = math.sqrt %14 : vector<8x1xf32>
    %cst_9 = arith.constant 9.99999997E-7 : f32
    %18 = vector.broadcast %cst_9 : f32 to vector<8x1xf32>
    %19 = arith.addf %17, %18 : vector<8x1xf32>
    %20 = vector.broadcast %19 : vector<8x1xf32> to vector<8x32xf32>
    %21 = arith.divf %16, %20 : vector<8x32xf32>
    %22 = vector.broadcast %3 : vector<1x32xf32> to vector<8x32xf32>
    %23 = arith.addf %21, %22 : vector<8x32xf32>
    %24 = arith.truncf %23 : vector<8x32xf32> to vector<8x32xbf16>
    %c0_10 = arith.constant 0 : index
    %c0_11 = arith.constant 0 : index
    %25 = vector.load %arg5[%c0_10, %c0_11] : memref<32x96xbf16, #tpu.memory_space<vmem>>, vector<32x96xbf16>
    %cst_12 = arith.constant dense<0.000000e+00> : vector<8x96xf32>
    %26 = tpu.matmul %24, %25, %cst_12 {dimension_numbers = #tpu.dot_dimension_numbers<[1], [0], [0], [1], [0, 0, 1, 1], [], []>} : vector<8x32xbf16>, vector<32x96xbf16>, vector<8x96xf32> -> vector<8x96xf32>
    %c0_13 = arith.constant 0 : index
    %c0_14 = arith.constant 0 : index
    %27 = vector.load %arg6[%c0_13, %c0_14] : memref<1x96xf32, #tpu.memory_space<vmem>>, vector<1x96xf32>
    %28 = vector.broadcast %27 : vector<1x96xf32> to vector<8x96xf32>
    %29 = arith.addf %26, %28 : vector<8x96xf32>
    %30 = vector.extract_strided_slice %29 {offsets = [0, 0], sizes = [8, 32], strides = [1, 1]} : vector<8x96xf32> to vector<8x32xf32>
    %31 = arith.truncf %30 : vector<8x32xf32> to vector<8x32xbf16>
    %c0_15 = arith.constant 0 : index
    %c0_16 = arith.constant 0 : index
    %c0_17 = arith.constant 0 : index
    %32 = vector.load %arg7[%c0_15, %c0_16, %c0_17] : memref<1x8x32xbf16, #tpu.memory_space<vmem>>, vector<1x8x32xbf16>
    %33 = vector.shape_cast %32 : vector<1x8x32xbf16> to vector<8x32xbf16>
    %34 = vector.shape_cast %31 : vector<8x32xbf16> to vector<1x8x32xbf16>
    tpu.vector_store %arg7[%c0_15, %c0_16, %c0_17], %34 {strides = array<i32>} : memref<1x8x32xbf16, #tpu.memory_space<vmem>>, vector<1x8x32xbf16>,
    %35 = vector.extract_strided_slice %29 {offsets = [0, 32], sizes = [8, 32], strides = [1, 1]} : vector<8x96xf32> to vector<8x32xf32>
    %36 = arith.truncf %35 : vector<8x32xf32> to vector<8x32xbf16>
    %c0_18 = arith.constant 0 : index
    %c0_19 = arith.constant 0 : index
    %c0_20 = arith.constant 0 : index
    %37 = vector.load %arg8[%c0_18, %c0_19, %c0_20] : memref<1x8x32xbf16, #tpu.memory_space<vmem>>, vector<1x8x32xbf16>
    %38 = vector.shape_cast %37 : vector<1x8x32xbf16> to vector<8x32xbf16>
    %39 = vector.shape_cast %36 : vector<8x32xbf16> to vector<1x8x32xbf16>
    tpu.vector_store %arg8[%c0_18, %c0_19, %c0_20], %39 {strides = array<i32>} : memref<1x8x32xbf16, #tpu.memory_space<vmem>>, vector<1x8x32xbf16>,
    %40 = vector.extract_strided_slice %29 {offsets = [0, 64], sizes = [8, 32], strides = [1, 1]} : vector<8x96xf32> to vector<8x32xf32>
    %41 = arith.truncf %40 : vector<8x32xf32> to vector<8x32xbf16>
    %c0_21 = arith.constant 0 : index
    %c0_22 = arith.constant 0 : index
    %c0_23 = arith.constant 0 : index
    %42 = vector.load %arg9[%c0_21, %c0_22, %c0_23] : memref<1x8x32xbf16, #tpu.memory_space<vmem>>, vector<1x8x32xbf16>
    %43 = vector.shape_cast %42 : vector<1x8x32xbf16> to vector<8x32xbf16>
    %44 = vector.shape_cast %41 : vector<8x32xbf16> to vector<1x8x32xbf16>
    tpu.vector_store %arg9[%c0_21, %c0_22, %c0_23], %44 {strides = array<i32>} : memref<1x8x32xbf16, #tpu.memory_space<vmem>>, vector<1x8x32xbf16>,
    return
  }
  func.func @transform_0(%arg0: i32, %arg1: i32) -> (i32, i32, i32) {
    %c0_i32 = arith.constant 0 : i32
    %c0_i32_0 = arith.constant 0 : i32
    return %arg0, %arg1, %c0_i32 : i32, i32, i32
  }
  func.func @transform_1(%arg0: i32, %arg1: i32) -> (i32, i32) {
    %c0_i32 = arith.constant 0 : i32
    %c0_i32_0 = arith.constant 0 : i32
    %c0_i32_1 = arith.constant 0 : i32
    return %c0_i32, %c0_i32_0 : i32, i32
  }
  func.func @transform_2(%arg0: i32, %arg1: i32) -> (i32, i32) {
    %c0_i32 = arith.constant 0 : i32
    %c0_i32_0 = arith.constant 0 : i32
    %c0_i32_1 = arith.constant 0 : i32
    return %c0_i32, %c0_i32_0 : i32, i32
  }
  func.func @transform_3(%arg0: i32, %arg1: i32) -> (i32, i32) {
    %c0_i32 = arith.constant 0 : i32
    %c0_i32_0 = arith.constant 0 : i32
    %c0_i32_1 = arith.constant 0 : i32
    return %c0_i32, %c0_i32_0 : i32, i32
  }
  func.func @transform_4(%arg0: i32, %arg1: i32) -> (i32, i32) {
    %c0_i32 = arith.constant 0 : i32
    %c0_i32_0 = arith.constant 0 : i32
    %c0_i32_1 = arith.constant 0 : i32
    return %c0_i32, %c0_i32_0 : i32, i32
  }
  func.func @transform_5(%arg0: i32, %arg1: i32) -> (i32, i32, i32) {
    %c0_i32 = arith.constant 0 : i32
    %c0_i32_0 = arith.constant 0 : i32
    return %arg0, %arg1, %c0_i32 : i32, i32, i32
  }
  func.func @transform_6(%arg0: i32, %arg1: i32) -> (i32, i32, i32) {
    %c0_i32 = arith.constant 0 : i32
    %c0_i32_0 = arith.constant 0 : i32
    return %arg0, %arg1, %c0_i32 : i32, i32, i32
  }
  func.func @transform_7(%arg0: i32, %arg1: i32) -> (i32, i32, i32) {
    %c0_i32 = arith.constant 0 : i32
    %c0_i32_0 = arith.constant 0 : i32
    return %arg0, %arg1, %c0_i32 : i32, i32, i32
  }
}

module attributes {stable_mosaic.version = 11 : i64} {
  func.func @attention_kernel(%arg0: i32, %arg1: i32, %arg2: memref<1x1x8xf32, #tpu.memory_space<vmem>>, %arg3: memref<1x8x32xbf16, #tpu.memory_space<vmem>>, %arg4: memref<1x8x32xbf16, #tpu.memory_space<vmem>>, %arg5: memref<1x8x32xbf16, #tpu.memory_space<vmem>>, %arg6: memref<1x8x32xbf16, #tpu.memory_space<vmem>>) attributes {dimension_semantics = [#tpu.dimension_semantics<parallel>, #tpu.dimension_semantics<parallel>], iteration_bounds = array<i64: 2, 1>, scalar_prefetch = 0 : i64, scratch_operands = 0 : i64, tpu.core_type = #tpu.core_type<tc>, window_params = [{transform_indices = @transform_0, window_bounds = array<i64: 1, 1, 8>}, {transform_indices = @transform_1, window_bounds = array<i64: 1, 8, 32>}, {transform_indices = @transform_2, window_bounds = array<i64: 1, 8, 32>}, {transform_indices = @transform_3, window_bounds = array<i64: 1, 8, 32>}, {transform_indices = @transform_4, window_bounds = array<i64: 1, 8, 32>}]} {
    %c0 = arith.constant 0 : index
    %c0_0 = arith.constant 0 : index
    %c0_1 = arith.constant 0 : index
    %0 = vector.load %arg3[%c0, %c0_0, %c0_1] : memref<1x8x32xbf16, #tpu.memory_space<vmem>>, vector<1x8x32xbf16>
    %1 = vector.shape_cast %0 : vector<1x8x32xbf16> to vector<8x32xbf16>
    %c0_2 = arith.constant 0 : index
    %c0_3 = arith.constant 0 : index
    %c0_4 = arith.constant 0 : index
    %2 = vector.load %arg4[%c0_2, %c0_3, %c0_4] : memref<1x8x32xbf16, #tpu.memory_space<vmem>>, vector<1x8x32xbf16>
    %3 = vector.shape_cast %2 : vector<1x8x32xbf16> to vector<8x32xbf16>
    %c0_5 = arith.constant 0 : index
    %c0_6 = arith.constant 0 : index
    %c0_7 = arith.constant 0 : index
    %4 = vector.load %arg5[%c0_5, %c0_6, %c0_7] : memref<1x8x32xbf16, #tpu.memory_space<vmem>>, vector<1x8x32xbf16>
    %5 = vector.shape_cast %4 : vector<1x8x32xbf16> to vector<8x32xbf16>
    %c0_8 = arith.constant 0 : index
    %c0_9 = arith.constant 0 : index
    %c0_10 = arith.constant 0 : index
    %6 = vector.load %arg2[%c0_8, %c0_9, %c0_10] : memref<1x1x8xf32, #tpu.memory_space<vmem>>, vector<1x1x8xf32>
    %7 = vector.shape_cast %6 : vector<1x1x8xf32> to vector<1x8xf32>
    %8 = vector.extract_strided_slice %1 {offsets = [0, 0], sizes = [8, 8], strides = [1, 1]} : vector<8x32xbf16> to vector<8x8xbf16>
    %9 = vector.extract_strided_slice %3 {offsets = [0, 0], sizes = [8, 8], strides = [1, 1]} : vector<8x32xbf16> to vector<8x8xbf16>
    "tpu.trace_start"() <{level = 10 : i32, message = "qd,kd->qk"}> : () -> ()
    %cst = arith.constant dense<0.000000e+00> : vector<8x8xf32>
    %10 = tpu.matmul %8, %9, %cst {dimension_numbers = #tpu.dot_dimension_numbers<[1], [1], [0], [0], [0, 0, 1, 0], [], []>} : vector<8x8xbf16>, vector<8x8xbf16>, vector<8x8xf32> -> vector<8x8xf32>
    "tpu.trace_stop"() : () -> ()
    %11 = vector.broadcast %7 : vector<1x8xf32> to vector<8x8xf32>
    %12 = arith.addf %10, %11 : vector<8x8xf32>
    %cst_11 = arith.constant dense<0xFF800000> : vector<8xf32>
    %13 = vector.multi_reduction <maximumf>, %12, %cst_11 [1] : vector<8x8xf32> to vector<8xf32>
    %14 = vector.shape_cast %13 : vector<8xf32> to vector<8x1xf32>
    %15 = vector.broadcast %14 : vector<8x1xf32> to vector<8x8xf32>
    %16 = arith.subf %12, %15 : vector<8x8xf32>
    %17 = math.exp %16 : vector<8x8xf32>
    %cst_12 = arith.constant dense<0.000000e+00> : vector<8xf32>
    %18 = vector.multi_reduction <add>, %17, %cst_12 [1] : vector<8x8xf32> to vector<8xf32>
    %19 = vector.shape_cast %18 : vector<8xf32> to vector<8x1xf32>
    %20 = tpu.reciprocal %19 {approx = true} : vector<8x1xf32> -> vector<8x1xf32>
    %21 = vector.broadcast %20 : vector<8x1xf32> to vector<8x8xf32>
    %22 = arith.mulf %17, %21 : vector<8x8xf32>
    %23 = arith.truncf %22 : vector<8x8xf32> to vector<8x8xbf16>
    %24 = vector.extract_strided_slice %5 {offsets = [0, 0], sizes = [8, 8], strides = [1, 1]} : vector<8x32xbf16> to vector<8x8xbf16>
    %cst_13 = arith.constant dense<0.000000e+00> : vector<8x8xf32>
    %25 = tpu.matmul %23, %24, %cst_13 {dimension_numbers = #tpu.dot_dimension_numbers<[1], [0], [0], [1], [0, 0, 1, 1], [], []>} : vector<8x8xbf16>, vector<8x8xbf16>, vector<8x8xf32> -> vector<8x8xf32>
    %26 = vector.extract_strided_slice %1 {offsets = [0, 8], sizes = [8, 8], strides = [1, 1]} : vector<8x32xbf16> to vector<8x8xbf16>
    %27 = vector.extract_strided_slice %3 {offsets = [0, 8], sizes = [8, 8], strides = [1, 1]} : vector<8x32xbf16> to vector<8x8xbf16>
    "tpu.trace_start"() <{level = 10 : i32, message = "qd,kd->qk"}> : () -> ()
    %cst_14 = arith.constant dense<0.000000e+00> : vector<8x8xf32>
    %28 = tpu.matmul %26, %27, %cst_14 {dimension_numbers = #tpu.dot_dimension_numbers<[1], [1], [0], [0], [0, 0, 1, 0], [], []>} : vector<8x8xbf16>, vector<8x8xbf16>, vector<8x8xf32> -> vector<8x8xf32>
    "tpu.trace_stop"() : () -> ()
    %29 = vector.broadcast %7 : vector<1x8xf32> to vector<8x8xf32>
    %30 = arith.addf %28, %29 : vector<8x8xf32>
    %cst_15 = arith.constant dense<0xFF800000> : vector<8xf32>
    %31 = vector.multi_reduction <maximumf>, %30, %cst_15 [1] : vector<8x8xf32> to vector<8xf32>
    %32 = vector.shape_cast %31 : vector<8xf32> to vector<8x1xf32>
    %33 = vector.broadcast %32 : vector<8x1xf32> to vector<8x8xf32>
    %34 = arith.subf %30, %33 : vector<8x8xf32>
    %35 = math.exp %34 : vector<8x8xf32>
    %cst_16 = arith.constant dense<0.000000e+00> : vector<8xf32>
    %36 = vector.multi_reduction <add>, %35, %cst_16 [1] : vector<8x8xf32> to vector<8xf32>
    %37 = vector.shape_cast %36 : vector<8xf32> to vector<8x1xf32>
    %38 = tpu.reciprocal %37 {approx = true} : vector<8x1xf32> -> vector<8x1xf32>
    %39 = vector.broadcast %38 : vector<8x1xf32> to vector<8x8xf32>
    %40 = arith.mulf %35, %39 : vector<8x8xf32>
    %41 = arith.truncf %40 : vector<8x8xf32> to vector<8x8xbf16>
    %42 = vector.extract_strided_slice %5 {offsets = [0, 8], sizes = [8, 8], strides = [1, 1]} : vector<8x32xbf16> to vector<8x8xbf16>
    %cst_17 = arith.constant dense<0.000000e+00> : vector<8x8xf32>
    %43 = tpu.matmul %41, %42, %cst_17 {dimension_numbers = #tpu.dot_dimension_numbers<[1], [0], [0], [1], [0, 0, 1, 1], [], []>} : vector<8x8xbf16>, vector<8x8xbf16>, vector<8x8xf32> -> vector<8x8xf32>
    %44 = vector.extract_strided_slice %1 {offsets = [0, 16], sizes = [8, 8], strides = [1, 1]} : vector<8x32xbf16> to vector<8x8xbf16>
    %45 = vector.extract_strided_slice %3 {offsets = [0, 16], sizes = [8, 8], strides = [1, 1]} : vector<8x32xbf16> to vector<8x8xbf16>
    "tpu.trace_start"() <{level = 10 : i32, message = "qd,kd->qk"}> : () -> ()
    %cst_18 = arith.constant dense<0.000000e+00> : vector<8x8xf32>
    %46 = tpu.matmul %44, %45, %cst_18 {dimension_numbers = #tpu.dot_dimension_numbers<[1], [1], [0], [0], [0, 0, 1, 0], [], []>} : vector<8x8xbf16>, vector<8x8xbf16>, vector<8x8xf32> -> vector<8x8xf32>
    "tpu.trace_stop"() : () -> ()
    %47 = vector.broadcast %7 : vector<1x8xf32> to vector<8x8xf32>
    %48 = arith.addf %46, %47 : vector<8x8xf32>
    %cst_19 = arith.constant dense<0xFF800000> : vector<8xf32>
    %49 = vector.multi_reduction <maximumf>, %48, %cst_19 [1] : vector<8x8xf32> to vector<8xf32>
    %50 = vector.shape_cast %49 : vector<8xf32> to vector<8x1xf32>
    %51 = vector.broadcast %50 : vector<8x1xf32> to vector<8x8xf32>
    %52 = arith.subf %48, %51 : vector<8x8xf32>
    %53 = math.exp %52 : vector<8x8xf32>
    %cst_20 = arith.constant dense<0.000000e+00> : vector<8xf32>
    %54 = vector.multi_reduction <add>, %53, %cst_20 [1] : vector<8x8xf32> to vector<8xf32>
    %55 = vector.shape_cast %54 : vector<8xf32> to vector<8x1xf32>
    %56 = tpu.reciprocal %55 {approx = true} : vector<8x1xf32> -> vector<8x1xf32>
    %57 = vector.broadcast %56 : vector<8x1xf32> to vector<8x8xf32>
    %58 = arith.mulf %53, %57 : vector<8x8xf32>
    %59 = arith.truncf %58 : vector<8x8xf32> to vector<8x8xbf16>
    %60 = vector.extract_strided_slice %5 {offsets = [0, 16], sizes = [8, 8], strides = [1, 1]} : vector<8x32xbf16> to vector<8x8xbf16>
    %cst_21 = arith.constant dense<0.000000e+00> : vector<8x8xf32>
    %61 = tpu.matmul %59, %60, %cst_21 {dimension_numbers = #tpu.dot_dimension_numbers<[1], [0], [0], [1], [0, 0, 1, 1], [], []>} : vector<8x8xbf16>, vector<8x8xbf16>, vector<8x8xf32> -> vector<8x8xf32>
    %62 = vector.extract_strided_slice %1 {offsets = [0, 24], sizes = [8, 8], strides = [1, 1]} : vector<8x32xbf16> to vector<8x8xbf16>
    %63 = vector.extract_strided_slice %3 {offsets = [0, 24], sizes = [8, 8], strides = [1, 1]} : vector<8x32xbf16> to vector<8x8xbf16>
    "tpu.trace_start"() <{level = 10 : i32, message = "qd,kd->qk"}> : () -> ()
    %cst_22 = arith.constant dense<0.000000e+00> : vector<8x8xf32>
    %64 = tpu.matmul %62, %63, %cst_22 {dimension_numbers = #tpu.dot_dimension_numbers<[1], [1], [0], [0], [0, 0, 1, 0], [], []>} : vector<8x8xbf16>, vector<8x8xbf16>, vector<8x8xf32> -> vector<8x8xf32>
    "tpu.trace_stop"() : () -> ()
    %65 = vector.broadcast %7 : vector<1x8xf32> to vector<8x8xf32>
    %66 = arith.addf %64, %65 : vector<8x8xf32>
    %cst_23 = arith.constant dense<0xFF800000> : vector<8xf32>
    %67 = vector.multi_reduction <maximumf>, %66, %cst_23 [1] : vector<8x8xf32> to vector<8xf32>
    %68 = vector.shape_cast %67 : vector<8xf32> to vector<8x1xf32>
    %69 = vector.broadcast %68 : vector<8x1xf32> to vector<8x8xf32>
    %70 = arith.subf %66, %69 : vector<8x8xf32>
    %71 = math.exp %70 : vector<8x8xf32>
    %cst_24 = arith.constant dense<0.000000e+00> : vector<8xf32>
    %72 = vector.multi_reduction <add>, %71, %cst_24 [1] : vector<8x8xf32> to vector<8xf32>
    %73 = vector.shape_cast %72 : vector<8xf32> to vector<8x1xf32>
    %74 = tpu.reciprocal %73 {approx = true} : vector<8x1xf32> -> vector<8x1xf32>
    %75 = vector.broadcast %74 : vector<8x1xf32> to vector<8x8xf32>
    %76 = arith.mulf %71, %75 : vector<8x8xf32>
    %77 = arith.truncf %76 : vector<8x8xf32> to vector<8x8xbf16>
    %78 = vector.extract_strided_slice %5 {offsets = [0, 24], sizes = [8, 8], strides = [1, 1]} : vector<8x32xbf16> to vector<8x8xbf16>
    %cst_25 = arith.constant dense<0.000000e+00> : vector<8x8xf32>
    %79 = tpu.matmul %77, %78, %cst_25 {dimension_numbers = #tpu.dot_dimension_numbers<[1], [0], [0], [1], [0, 0, 1, 1], [], []>} : vector<8x8xbf16>, vector<8x8xbf16>, vector<8x8xf32> -> vector<8x8xf32>
    %80 = tpu.concatenate %25, %43, %61, %79 in 1 : vector<8x8xf32>, vector<8x8xf32>, vector<8x8xf32>, vector<8x8xf32> -> vector<8x32xf32>
    %81 = arith.truncf %80 : vector<8x32xf32> to vector<8x32xbf16>
    %c0_26 = arith.constant 0 : index
    %c0_27 = arith.constant 0 : index
    %c0_28 = arith.constant 0 : index
    %82 = vector.load %arg6[%c0_26, %c0_27, %c0_28] : memref<1x8x32xbf16, #tpu.memory_space<vmem>>, vector<1x8x32xbf16>
    %83 = vector.shape_cast %82 : vector<1x8x32xbf16> to vector<8x32xbf16>
    %84 = vector.shape_cast %81 : vector<8x32xbf16> to vector<1x8x32xbf16>
    tpu.vector_store %arg6[%c0_26, %c0_27, %c0_28], %84 {strides = array<i32>} : memref<1x8x32xbf16, #tpu.memory_space<vmem>>, vector<1x8x32xbf16>,
    return
  }
  func.func @transform_0(%arg0: i32, %arg1: i32) -> (i32, i32, i32) {
    %c0_i32 = arith.constant 0 : i32
    %c0_i32_0 = arith.constant 0 : i32
    %c0_i32_1 = arith.constant 0 : i32
    return %arg0, %c0_i32, %c0_i32_0 : i32, i32, i32
  }
  func.func @transform_1(%arg0: i32, %arg1: i32) -> (i32, i32, i32) {
    %c0_i32 = arith.constant 0 : i32
    %c0_i32_0 = arith.constant 0 : i32
    return %arg0, %arg1, %c0_i32 : i32, i32, i32
  }
  func.func @transform_2(%arg0: i32, %arg1: i32) -> (i32, i32, i32) {
    %c0_i32 = arith.constant 0 : i32
    %c0_i32_0 = arith.constant 0 : i32
    %c0_i32_1 = arith.constant 0 : i32
    return %arg0, %c0_i32, %c0_i32_0 : i32, i32, i32
  }
  func.func @transform_3(%arg0: i32, %arg1: i32) -> (i32, i32, i32) {
    %c0_i32 = arith.constant 0 : i32
    %c0_i32_0 = arith.constant 0 : i32
    %c0_i32_1 = arith.constant 0 : i32
    return %arg0, %c0_i32, %c0_i32_0 : i32, i32, i32
  }
  func.func @transform_4(%arg0: i32, %arg1: i32) -> (i32, i32, i32) {
    %c0_i32 = arith.constant 0 : i32
    %c0_i32_0 = arith.constant 0 : i32
    return %arg0, %arg1, %c0_i32 : i32, i32, i32
  }
}

module attributes {stable_mosaic.version = 11 : i64} {
  func.func @final_ln_kernel(%arg0: i32, %arg1: i32, %arg2: memref<1x8x32xf32, #tpu.memory_space<vmem>>, %arg3: memref<1x32xf32, #tpu.memory_space<vmem>>, %arg4: memref<1x32xf32, #tpu.memory_space<vmem>>, %arg5: memref<1x8x32xf32, #tpu.memory_space<vmem>>) attributes {dimension_semantics = [#tpu.dimension_semantics<parallel>, #tpu.dimension_semantics<parallel>], iteration_bounds = array<i64: 2, 1>, scalar_prefetch = 0 : i64, scratch_operands = 0 : i64, tpu.core_type = #tpu.core_type<tc>, window_params = [{transform_indices = @transform_0, window_bounds = array<i64: 1, 8, 32>}, {pipeline_mode = #tpu.pipeline_mode<synchronous>, transform_indices = @transform_1, window_bounds = array<i64: 1, 32>}, {pipeline_mode = #tpu.pipeline_mode<synchronous>, transform_indices = @transform_2, window_bounds = array<i64: 1, 32>}, {transform_indices = @transform_3, window_bounds = array<i64: 1, 8, 32>}]} {
    %c0 = arith.constant 0 : index
    %c0_0 = arith.constant 0 : index
    %c0_1 = arith.constant 0 : index
    %0 = vector.load %arg2[%c0, %c0_0, %c0_1] : memref<1x8x32xf32, #tpu.memory_space<vmem>>, vector<1x8x32xf32>
    %1 = vector.shape_cast %0 : vector<1x8x32xf32> to vector<8x32xf32>
    %c0_2 = arith.constant 0 : index
    %c0_3 = arith.constant 0 : index
    %2 = vector.load %arg3[%c0_2, %c0_3] : memref<1x32xf32, #tpu.memory_space<vmem>>, vector<1x32xf32>
    %c0_4 = arith.constant 0 : index
    %c0_5 = arith.constant 0 : index
    %3 = vector.load %arg4[%c0_4, %c0_5] : memref<1x32xf32, #tpu.memory_space<vmem>>, vector<1x32xf32>
    %cst = arith.constant dense<0.000000e+00> : vector<8xf32>
    %4 = vector.multi_reduction <add>, %1, %cst [1] : vector<8x32xf32> to vector<8xf32>
    %5 = vector.shape_cast %4 : vector<8xf32> to vector<8x1xf32>
    %cst_6 = arith.constant 3.200000e+01 : f32
    %6 = vector.broadcast %cst_6 : f32 to vector<8x1xf32>
    %7 = arith.divf %5, %6 : vector<8x1xf32>
    %8 = vector.broadcast %7 : vector<8x1xf32> to vector<8x32xf32>
    %9 = arith.subf %1, %8 : vector<8x32xf32>
    %10 = arith.mulf %9, %9 : vector<8x32xf32>
    %cst_7 = arith.constant dense<0.000000e+00> : vector<8xf32>
    %11 = vector.multi_reduction <add>, %10, %cst_7 [1] : vector<8x32xf32> to vector<8xf32>
    %12 = vector.shape_cast %11 : vector<8xf32> to vector<8x1xf32>
    %cst_8 = arith.constant 3.100000e+01 : f32
    %13 = vector.broadcast %cst_8 : f32 to vector<8x1xf32>
    %14 = arith.divf %12, %13 : vector<8x1xf32>
    %15 = vector.broadcast %2 : vector<1x32xf32> to vector<8x32xf32>
    %16 = arith.mulf %15, %9 : vector<8x32xf32>
    %17 = math.sqrt %14 : vector<8x1xf32>
    %cst_9 = arith.constant 9.99999997E-7 : f32
    %18 = vector.broadcast %cst_9 : f32 to vector<8x1xf32>
    %19 = arith.addf %17, %18 : vector<8x1xf32>
    %20 = vector.broadcast %19 : vector<8x1xf32> to vector<8x32xf32>
    %21 = arith.divf %16, %20 : vector<8x32xf32>
    %22 = vector.broadcast %3 : vector<1x32xf32> to vector<8x32xf32>
    %23 = arith.addf %21, %22 : vector<8x32xf32>
    %c0_10 = arith.constant 0 : index
    %c0_11 = arith.constant 0 : index
    %c0_12 = arith.constant 0 : index
    %24 = vector.load %arg5[%c0_10, %c0_11, %c0_12] : memref<1x8x32xf32, #tpu.memory_space<vmem>>, vector<1x8x32xf32>
    %25 = vector.shape_cast %24 : vector<1x8x32xf32> to vector<8x32xf32>
    %26 = vector.shape_cast %23 : vector<8x32xf32> to vector<1x8x32xf32>
    tpu.vector_store %arg5[%c0_10, %c0_11, %c0_12], %26 {strides = array<i32>} : memref<1x8x32xf32, #tpu.memory_space<vmem>>, vector<1x8x32xf32>,
    return
  }
  func.func @transform_0(%arg0: i32, %arg1: i32) -> (i32, i32, i32) {
    %c0_i32 = arith.constant 0 : i32
    %c0_i32_0 = arith.constant 0 : i32
    return %arg0, %arg1, %c0_i32 : i32, i32, i32
  }
  func.func @transform_1(%arg0: i32, %arg1: i32) -> (i32, i32) {
    %c0_i32 = arith.constant 0 : i32
    %c0_i32_0 = arith.constant 0 : i32
    %c0_i32_1 = arith.constant 0 : i32
    return %c0_i32, %c0_i32_0 : i32, i32
  }
  func.func @transform_2(%arg0: i32, %arg1: i32) -> (i32, i32) {
    %c0_i32 = arith.constant 0 : i32
    %c0_i32_0 = arith.constant 0 : i32
    %c0_i32_1 = arith.constant 0 : i32
    return %c0_i32, %c0_i32_0 : i32, i32
  }
  func.func @transform_3(%arg0: i32, %arg1: i32) -> (i32, i32, i32) {
    %c0_i32 = arith.constant 0 : i32
    %c0_i32_0 = arith.constant 0 : i32
    return %arg0, %arg1, %c0_i32 : i32, i32, i32
  }
}

module attributes {stable_mosaic.version = 11 : i64} {
  func.func @out_ffn_kernel(%arg0: i32, %arg1: i32, %arg2: memref<1x8x32xf32, #tpu.memory_space<vmem>>, %arg3: memref<1x8x32xbf16, #tpu.memory_space<vmem>>, %arg4: memref<32x32xbf16, #tpu.memory_space<vmem>>, %arg5: memref<1x32xf32, #tpu.memory_space<vmem>>, %arg6: memref<1x32xf32, #tpu.memory_space<vmem>>, %arg7: memref<1x32xf32, #tpu.memory_space<vmem>>, %arg8: memref<32x64xbf16, #tpu.memory_space<vmem>>, %arg9: memref<1x64xf32, #tpu.memory_space<vmem>>, %arg10: memref<64x32xbf16, #tpu.memory_space<vmem>>, %arg11: memref<1x32xf32, #tpu.memory_space<vmem>>, %arg12: memref<1x8x32xf32, #tpu.memory_space<vmem>>) attributes {dimension_semantics = [#tpu.dimension_semantics<parallel>, #tpu.dimension_semantics<parallel>], iteration_bounds = array<i64: 2, 1>, scalar_prefetch = 0 : i64, scratch_operands = 0 : i64, tpu.core_type = #tpu.core_type<tc>, window_params = [{transform_indices = @transform_0, window_bounds = array<i64: 1, 8, 32>}, {transform_indices = @transform_1, window_bounds = array<i64: 1, 8, 32>}, {pipeline_mode = #tpu.pipeline_mode<synchronous>, transform_indices = @transform_2, window_bounds = array<i64: 32, 32>}, {pipeline_mode = #tpu.pipeline_mode<synchronous>, transform_indices = @transform_3, window_bounds = array<i64: 1, 32>}, {pipeline_mode = #tpu.pipeline_mode<synchronous>, transform_indices = @transform_4, window_bounds = array<i64: 1, 32>}, {pipeline_mode = #tpu.pipeline_mode<synchronous>, transform_indices = @transform_5, window_bounds = array<i64: 1, 32>}, {pipeline_mode = #tpu.pipeline_mode<synchronous>, transform_indices = @transform_6, window_bounds = array<i64: 32, 64>}, {pipeline_mode = #tpu.pipeline_mode<synchronous>, transform_indices = @transform_7, window_bounds = array<i64: 1, 64>}, {pipeline_mode = #tpu.pipeline_mode<synchronous>, transform_indices = @transform_8, window_bounds = array<i64: 64, 32>}, {pipeline_mode = #tpu.pipeline_mode<synchronous>, transform_indices = @transform_9, window_bounds = array<i64: 1, 32>}, {transform_indices = @transform_10, window_bounds = array<i64: 1, 8, 32>}]} {
    %c0 = arith.constant 0 : index
    %c0_0 = arith.constant 0 : index
    %c0_1 = arith.constant 0 : index
    %0 = vector.load %arg2[%c0, %c0_0, %c0_1] : memref<1x8x32xf32, #tpu.memory_space<vmem>>, vector<1x8x32xf32>
    %1 = vector.shape_cast %0 : vector<1x8x32xf32> to vector<8x32xf32>
    %c0_2 = arith.constant 0 : index
    %c0_3 = arith.constant 0 : index
    %c0_4 = arith.constant 0 : index
    %2 = vector.load %arg3[%c0_2, %c0_3, %c0_4] : memref<1x8x32xbf16, #tpu.memory_space<vmem>>, vector<1x8x32xbf16>
    %3 = vector.shape_cast %2 : vector<1x8x32xbf16> to vector<8x32xbf16>
    %c0_5 = arith.constant 0 : index
    %c0_6 = arith.constant 0 : index
    %4 = vector.load %arg4[%c0_5, %c0_6] : memref<32x32xbf16, #tpu.memory_space<vmem>>, vector<32x32xbf16>
    %cst = arith.constant dense<0.000000e+00> : vector<8x32xf32>
    %5 = tpu.matmul %3, %4, %cst {dimension_numbers = #tpu.dot_dimension_numbers<[1], [0], [0], [1], [0, 0, 1, 1], [], []>} : vector<8x32xbf16>, vector<32x32xbf16>, vector<8x32xf32> -> vector<8x32xf32>
    %c0_7 = arith.constant 0 : index
    %c0_8 = arith.constant 0 : index
    %6 = vector.load %arg5[%c0_7, %c0_8] : memref<1x32xf32, #tpu.memory_space<vmem>>, vector<1x32xf32>
    %7 = vector.broadcast %6 : vector<1x32xf32> to vector<8x32xf32>
    %8 = arith.addf %5, %7 : vector<8x32xf32>
    %9 = arith.addf %1, %8 : vector<8x32xf32>
    %c0_9 = arith.constant 0 : index
    %c0_10 = arith.constant 0 : index
    %10 = vector.load %arg6[%c0_9, %c0_10] : memref<1x32xf32, #tpu.memory_space<vmem>>, vector<1x32xf32>
    %c0_11 = arith.constant 0 : index
    %c0_12 = arith.constant 0 : index
    %11 = vector.load %arg7[%c0_11, %c0_12] : memref<1x32xf32, #tpu.memory_space<vmem>>, vector<1x32xf32>
    %cst_13 = arith.constant dense<0.000000e+00> : vector<8xf32>
    %12 = vector.multi_reduction <add>, %9, %cst_13 [1] : vector<8x32xf32> to vector<8xf32>
    %13 = vector.shape_cast %12 : vector<8xf32> to vector<8x1xf32>
    %cst_14 = arith.constant 3.200000e+01 : f32
    %14 = vector.broadcast %cst_14 : f32 to vector<8x1xf32>
    %15 = arith.divf %13, %14 : vector<8x1xf32>
    %16 = vector.broadcast %15 : vector<8x1xf32> to vector<8x32xf32>
    %17 = arith.subf %9, %16 : vector<8x32xf32>
    %18 = arith.mulf %17, %17 : vector<8x32xf32>
    %cst_15 = arith.constant dense<0.000000e+00> : vector<8xf32>
    %19 = vector.multi_reduction <add>, %18, %cst_15 [1] : vector<8x32xf32> to vector<8xf32>
    %20 = vector.shape_cast %19 : vector<8xf32> to vector<8x1xf32>
    %cst_16 = arith.constant 3.100000e+01 : f32
    %21 = vector.broadcast %cst_16 : f32 to vector<8x1xf32>
    %22 = arith.divf %20, %21 : vector<8x1xf32>
    %23 = vector.broadcast %10 : vector<1x32xf32> to vector<8x32xf32>
    %24 = arith.mulf %23, %17 : vector<8x32xf32>
    %25 = math.sqrt %22 : vector<8x1xf32>
    %cst_17 = arith.constant 9.99999997E-7 : f32
    %26 = vector.broadcast %cst_17 : f32 to vector<8x1xf32>
    %27 = arith.addf %25, %26 : vector<8x1xf32>
    %28 = vector.broadcast %27 : vector<8x1xf32> to vector<8x32xf32>
    %29 = arith.divf %24, %28 : vector<8x32xf32>
    %30 = vector.broadcast %11 : vector<1x32xf32> to vector<8x32xf32>
    %31 = arith.addf %29, %30 : vector<8x32xf32>
    %32 = arith.truncf %31 : vector<8x32xf32> to vector<8x32xbf16>
    %c0_18 = arith.constant 0 : index
    %c0_19 = arith.constant 0 : index
    %33 = vector.load %arg8[%c0_18, %c0_19] : memref<32x64xbf16, #tpu.memory_space<vmem>>, vector<32x64xbf16>
    %cst_20 = arith.constant dense<0.000000e+00> : vector<8x64xf32>
    %34 = tpu.matmul %32, %33, %cst_20 {dimension_numbers = #tpu.dot_dimension_numbers<[1], [0], [0], [1], [0, 0, 1, 1], [], []>} : vector<8x32xbf16>, vector<32x64xbf16>, vector<8x64xf32> -> vector<8x64xf32>
    %c0_21 = arith.constant 0 : index
    %c0_22 = arith.constant 0 : index
    %35 = vector.load %arg9[%c0_21, %c0_22] : memref<1x64xf32, #tpu.memory_space<vmem>>, vector<1x64xf32>
    %36 = vector.broadcast %35 : vector<1x64xf32> to vector<8x64xf32>
    %37 = arith.addf %34, %36 : vector<8x64xf32>
    %cst_23 = arith.constant 0.000000e+00 : f32
    %38 = vector.broadcast %cst_23 : f32 to vector<8x64xf32>
    %39 = arith.maximumf %37, %38 : vector<8x64xf32>
    %40 = arith.truncf %39 : vector<8x64xf32> to vector<8x64xbf16>
    %c0_24 = arith.constant 0 : index
    %c0_25 = arith.constant 0 : index
    %41 = vector.load %arg10[%c0_24, %c0_25] : memref<64x32xbf16, #tpu.memory_space<vmem>>, vector<64x32xbf16>
    %cst_26 = arith.constant dense<0.000000e+00> : vector<8x32xf32>
    %42 = tpu.matmul %40, %41, %cst_26 {dimension_numbers = #tpu.dot_dimension_numbers<[1], [0], [0], [1], [0, 0, 1, 1], [], []>} : vector<8x64xbf16>, vector<64x32xbf16>, vector<8x32xf32> -> vector<8x32xf32>
    %c0_27 = arith.constant 0 : index
    %c0_28 = arith.constant 0 : index
    %43 = vector.load %arg11[%c0_27, %c0_28] : memref<1x32xf32, #tpu.memory_space<vmem>>, vector<1x32xf32>
    %44 = vector.broadcast %43 : vector<1x32xf32> to vector<8x32xf32>
    %45 = arith.addf %42, %44 : vector<8x32xf32>
    %46 = arith.addf %9, %45 : vector<8x32xf32>
    %c0_29 = arith.constant 0 : index
    %c0_30 = arith.constant 0 : index
    %c0_31 = arith.constant 0 : index
    %47 = vector.load %arg12[%c0_29, %c0_30, %c0_31] : memref<1x8x32xf32, #tpu.memory_space<vmem>>, vector<1x8x32xf32>
    %48 = vector.shape_cast %47 : vector<1x8x32xf32> to vector<8x32xf32>
    %49 = vector.shape_cast %46 : vector<8x32xf32> to vector<1x8x32xf32>
    tpu.vector_store %arg12[%c0_29, %c0_30, %c0_31], %49 {strides = array<i32>} : memref<1x8x32xf32, #tpu.memory_space<vmem>>, vector<1x8x32xf32>,
    return
  }
  func.func @transform_0(%arg0: i32, %arg1: i32) -> (i32, i32, i32) {
    %c0_i32 = arith.constant 0 : i32
    %c0_i32_0 = arith.constant 0 : i32
    return %arg0, %arg1, %c0_i32 : i32, i32, i32
  }
  func.func @transform_1(%arg0: i32, %arg1: i32) -> (i32, i32, i32) {
    %c0_i32 = arith.constant 0 : i32
    %c0_i32_0 = arith.constant 0 : i32
    return %arg0, %arg1, %c0_i32 : i32, i32, i32
  }
  func.func @transform_2(%arg0: i32, %arg1: i32) -> (i32, i32) {
    %c0_i32 = arith.constant 0 : i32
    %c0_i32_0 = arith.constant 0 : i32
    %c0_i32_1 = arith.constant 0 : i32
    return %c0_i32, %c0_i32_0 : i32, i32
  }
  func.func @transform_3(%arg0: i32, %arg1: i32) -> (i32, i32) {
    %c0_i32 = arith.constant 0 : i32
    %c0_i32_0 = arith.constant 0 : i32
    %c0_i32_1 = arith.constant 0 : i32
    return %c0_i32, %c0_i32_0 : i32, i32
  }
  func.func @transform_4(%arg0: i32, %arg1: i32) -> (i32, i32) {
    %c0_i32 = arith.constant 0 : i32
    %c0_i32_0 = arith.constant 0 : i32
    %c0_i32_1 = arith.constant 0 : i32
    return %c0_i32, %c0_i32_0 : i32, i32
  }
  func.func @transform_5(%arg0: i32, %arg1: i32) -> (i32, i32) {
    %c0_i32 = arith.constant 0 : i32
    %c0_i32_0 = arith.constant 0 : i32
    %c0_i32_1 = arith.constant 0 : i32
    return %c0_i32, %c0_i32_0 : i32, i32
  }
  func.func @transform_6(%arg0: i32, %arg1: i32) -> (i32, i32) {
    %c0_i32 = arith.constant 0 : i32
    %c0_i32_0 = arith.constant 0 : i32
    %c0_i32_1 = arith.constant 0 : i32
    return %c0_i32, %c0_i32_0 : i32, i32
  }
  func.func @transform_7(%arg0: i32, %arg1: i32) -> (i32, i32) {
    %c0_i32 = arith.constant 0 : i32
    %c0_i32_0 = arith.constant 0 : i32
    %c0_i32_1 = arith.constant 0 : i32
    return %c0_i32, %c0_i32_0 : i32, i32
  }
  func.func @transform_8(%arg0: i32, %arg1: i32) -> (i32, i32) {
    %c0_i32 = arith.constant 0 : i32
    %c0_i32_0 = arith.constant 0 : i32
    %c0_i32_1 = arith.constant 0 : i32
    return %c0_i32, %c0_i32_0 : i32, i32
  }
  func.func @transform_9(%arg0: i32, %arg1: i32) -> (i32, i32) {
    %c0_i32 = arith.constant 0 : i32
    %c0_i32_0 = arith.constant 0 : i32
    %c0_i32_1 = arith.constant 0 : i32
    return %c0_i32, %c0_i32_0 : i32, i32
  }
  func.func @transform_10(%arg0: i32, %arg1: i32) -> (i32, i32, i32) {
    %c0_i32 = arith.constant 0 : i32
    %c0_i32_0 = arith.constant 0 : i32
    return %arg0, %arg1, %c0_i32 : i32, i32, i32
  }
}

</mosaic_0001>

<bundles_post_ra>
// kernel: bert_forward.13
= control target key start
LH: loop header
LB: loop body
LE: loop exit
PB: predicated region body
PF: predicated region fallthrough
CT: control target
= control target key end

     0   :  { %8 = vsyncpa [#allocation3], 0  ;;  %s612_s0 = inlined_call_operand.vmem [shape: f32[2,8,32], index: 0, kind: input, shape index: {}]   ;;  %s613_s1 = inlined_call_operand.vmem [shape: f32[1,32], index: 1, kind: input, shape index: {}]   ;;  %s614_s2 = inlined_call_operand.vmem [shape: f32[1,32], index: 2, kind: input, shape index: {}]   ;;  %s615_s3 = inlined_call_operand.hbm [shape: f32[2,8,32], index: 3, kind: output, shape index: {}]  }
   0x1   :  { %10 = vsyncpa [#allocation3 + $0x1], 0  ;;  %s491_s12 = smov 0   ;;  %s493_s13 = smov 0  }
   0x2   :  { %s495_s14 = smov 0   ;;  %s497_s15 = smov 0  }
   0x3   :  { %s499_s16 = smov 0   ;;  %s501_s17 = smov 0  }
   0x4 LB: > { %s318_s18 = sadd.s32 4294967295, %s468_s17   ;;  %s319_s19 = sadd.s32 4294967294, %s468_s17   ;;  %s468_s17 = sphi %s501_s17, %s16_s17   ;;  %s464_s16 = sphi %s499_s16, %s622_s16   ;;  %s460_s15 = sphi %s497_s15, %s621_s15   ;;  %s456_s14 = sphi %s495_s14, %s620_s14   ;;  %s452_s13 = sphi %s493_s13, %s619_s13   ;;  %s448_s12 = sphi %s491_s12, %s618_s12  }
   0x5   : > { %s28_s20 = sadd.s32 1, %s464_s16  ;;  %s107_s21 = sadd.s32 1, %s456_s14 }
   0x6   : > { %p30_p0 = scmp.ge.s32.totalorder %s28_s20, 2  ;;  %p117_p1 = scmp.ne.s32.totalorder %s456_s14, %s452_s13 }
   0x7   : > { %p118_p2 = scmp.eq.s32.totalorder %s318_s18, 1  ;;  %p123_p3 = scmp.ne.s32.totalorder %s452_s13, %s448_s12 }
   0x8   : > { %s624_s20 = smov (%p30_p0, %s28_s20), 0  ;;  %p124_p5 = scmp.eq.s32.totalorder %s319_s19, 1 }
   0x9   : > { %p531_p4 = por %p118_p2, %p117_p1  ;;  %s102_s23 = ssub.s32 %s464_s16, %s624_s20 }
   0xa   : > { %p322_p6 = scmp.ge.s32.totalorder %s468_s17, 1  ;;  %p105_p7 = scmp.eq.s32.totalorder %s102_s23, 0 }
   0xb   : > { %p538_p8 = por %p124_p5, %p123_p3  ;;  %p158_p9 = scmp.lt.s32.totalorder %s468_s17, 3 }
   0xc   : > { %s544_s25 = scalar_select %p105_p7, %s456_s14, %s107_s21  }
   0xd   : > { %p159_p10 = pnand %p322_p6, %p158_p9 }
   0xe   : > { %p184_p11 = scmp.lt.s32.totalorder (!%p159_p10), %s460_s15, 1  ;;  %vm194_vm0 = vcmask (!%p159_p10), 261120   ;;  %s181_s4 = sand.u32 (!%p159_p10), 1, %s452_s13   ;;  %v325_v15 = vld [vmem:[%s613_s1] ss:$0 sm:$0xff] (!%p159_p10) }
   0xf   : > { %162 = sbr.rel (%p159_p10) target bundleno = 367 (0x16f), region = 32  ;;  %s323_s5 = sshll.u32 (!%p159_p10), %s181_s4, 3  ;;  %v326_v18 = vld [vmem:[%s614_s2] ss:$0 sm:$0xff] (!%p159_p10) }
  0x10   : > { %s328_s10 = sshll.u32 (!%p159_p10), %s460_s15, 7  ;;  %s183_s11 = scalar_lea.vmem (!%p159_p10), [#allocation2], %s323_s5 }
  0x11   : > { %s247_s18 = sshll.u32 (!%p159_p10), %s183_s11, 4  ;;  %s564_s23 = scalar_lea.hbm (!%p159_p10), %s615_s3, %s328_s10  ;;  %s566_s18 = int_to_ptr.vmem [resolvable:$true] %s247_s18 }
  0x16   : > { %s185_s26 = scalar_select %p184_p11, %s460_s15, 1 }
  0x17   : > { %s470_s15 = smov [#allocation2]  }
  0x18   : > { %s324_s27 = sshll.u32 %s185_s26, 3  ;;  %s233_s26 = scalar_lea.sflag [#allocation3], %s181_s4 }
  0x19   : > { %s190_s30 = scalar_lea.vmem %s612_s0, %s324_s27  ;;  %s390_s27 = scalar_lea.vmem %s566_s18, 128 }
  0x1a   : > { %v191_v0 = vld [vmem:[%s190_s30] sm:$0xff]  ;;  %p391_p12 = scmp.ne.s32.totalorder %s566_s18, %s390_s27  ;;  %s394_s28 = sshll.u32 %s470_s15, 4  ;;  %s395_s28 = int_to_ptr.vmem [resolvable:$false] %s394_s28 }
  0x1b   : > { %v195_v1 = vsel %vm194_vm0, %v191_v0, 0.0  ;;  %s396_s29 = scalar_lea.vmem %s395_s28, 256  ;;  %p397_p1 = scmp.lt.s32.totalorder %s566_s18, %s395_s28 }
  0x1c   : > { %196 = vadd.xlane.f32.xlu0 %v195_v1  ;;  %p392_p13 = pnand %p391_p12, %p531_p4  ;;  %p398_p2 = scmp.lt.s32.totalorder %s396_s29, %s390_s27 }
  0x1e   : > { %p393_p0 = pneg %p392_p13  ;;  %p399_p3 = por %p398_p2, %p397_p1 }
  0x20   : > { %p400_p5 = pnand %p399_p3, %p393_p0 }
  0xa9   : > { %v197_v2 = vpop.xlane.xlu0 %196 }
  0xaa   : > { %v199_v3 = vmul.f32 0.03125, %v197_v2 }
  0xac   : > { %v200_v4 = vsub.f32 %v191_v0, %v199_v3 }
  0xae   : > { %v201_v5 = vmul.f32 %v200_v4, %v200_v4  ;;  %v213_v16 = vmul.f32 %v325_v15, %v200_v4 }
  0xb0   : > { %v202_v6 = vsel %vm194_vm0, %v201_v5, 0.0 }
  0xb1   : > { %203 = vadd.xlane.f32.xlu0 %v202_v6 }
 0x13e   : > { %v204_v7 = vpop.xlane.xlu0 %203 }
 0x13f   : > { %v206_v8 = vmul.f32 0.032258064, %v204_v7 }
 0x141   : > { %386 = vrsqrt.f32 %v206_v8  ;;  %vm216_vm1 = vcmp.eq.f32.partialorder %v206_v8, inf  ;;  %v219_v11 = vand.u32 2147483648, %v206_v8  ;;  %vm218_vm2 = vcmp.eq.f32.partialorder %v206_v8, 0.0 }
 0x14b   : > { %v387_v9 = vpop.eup %386 }
 0x14c   : > { %v215_v10 = vmul.f32 %v387_v9, %v206_v8 }
 0x14e   : > { %v217_v12 = vsel %vm216_vm1, %v206_v8, %v215_v10 }
 0x14f   : > { %v220_v13 = vsel %vm218_vm2, %v219_v11, %v217_v12 }
 0x150   : > { %v221_v14 = vadd.f32 1e-06, %v220_v13 }
 0x152   : > { %388 = vrcp.f32 %v221_v14 }
 0x15c   : > { %v389_v17 = vpop.eup %388 }
 0x15d   : > { %v223_v19 = vmul.f32 %v389_v17, %v213_v16 }
 0x15f   : > { %v230_v20 = vadd.f32 %v326_v18, %v223_v19 }
 0x161   : > { %231 = vst.msk [vmem:[%s183_s11] sm:$0xff] %vm194_vm0, %v230_v20 }
 0x162   : > { %403 = shalt.err (!%p400_p5)
}
 0x163   : > { %s404_s30 = scalar_lea.hbm %s564_s23, 128  ;;  %s408_s6 = scalar_lea.hbm %s615_s3, 256 }
 0x164   : > { %p405_p6 = scmp.ne.s32.totalorder %s564_s23, %s404_s30  ;;  %p409_p10 = scmp.lt.u32.totalorder %s564_s23, %s615_s3 }
 0x165   : > { %p410_p11 = scmp.lt.u32.totalorder %s408_s6, %s404_s30  ;;  %p412_p13 = scmp.lt.u32.totalorder %s404_s30, %s564_s23 }
 0x166   : > { %p406_p7 = pnand %p405_p6, %p531_p4 }
 0x167   : > { %p411_p12 = por %p410_p11, %p409_p10 }
 0x168   : > { %p407_p9 = pneg %p406_p7 }
 0x169   : > { %p413_p0 = por %p412_p13, %p411_p12 }
 0x16b   : > { %p414_p1 = pnand %p413_p0, %p407_p9 }
 0x16d   : > { %417 = shalt.err (!%p414_p1)
}
 0x16e   : > { %331 = dma.vmem_to_hbm [thread:$0]  (%p531_p4), %s566_s18, 128, %s564_s23, %s233_s26  }
 0x16f PF: > { %p337_p2 = scmp.ge.s32.totalorder %s468_s17, 2  ;;  %s259_s9 = sand.u32 1, %s448_s12  }
 0x170   : > { %s260_s10 = scalar_lea.sflag [#allocation3], %s259_s9 }
 0x171   : > { %p334_p3 = pnand %p337_p2, %p538_p8 }
 0x173   : > { %443 = dma.done.wait (!%p334_p3), %s260_s10, 128  }
 0x174   : > { %445 = vsyncadd (!%p334_p3), %s260_s10, 4294967168  ;;  %s16_s17 = sadd.s32 1, %s468_s17   ;;  %s618_s12 = smov %s452_s13 }
 0x175   : > { %p13_p5 = scmp.ge.s32.totalorder %s16_s17, 4   ;;  %s619_s13 = smov %s456_s14 }
 0x176   : > { %s620_s14 = smov %s544_s25  ;;  %s621_s15 = smov %s464_s16 }
 0x177   : > { %s622_s16 = smov %s624_s20  ;;  %15 = sbr.rel (!%p13_p5) target bundleno = 4 (0x4), region = 67 }
 0x17e   :  { %265 = vsyncpa [#allocation3], 1 }
 0x17f   :  { %267 = vsyncpa [#allocation3 + $0x1], 1 }

// kernel: bert_forward.7
= control target key start
LH: loop header
LB: loop body
LE: loop exit
PB: predicated region body
PF: predicated region fallthrough
CT: control target
= control target key end

     0   :  { %s752_s24 = smov 0   ;;  %s754_s25 = smov 0   ;;  %s813_s0 = inlined_call_operand.vmem [shape: f32[2,8,32], index: 0, kind: input, shape index: {}]   ;;  %s814_s1 = inlined_call_operand.vmem [shape: f32[1,32], index: 1, kind: input, shape index: {}]   ;;  %s815_s2 = inlined_call_operand.vmem [shape: f32[1,32], index: 2, kind: input, shape index: {}]   ;;  %s816_s3 = inlined_call_operand.vmem [shape: bf16[32,96], index: 3, kind: input, shape index: {}]   ;;  %s817_s4 = inlined_call_operand.vmem [shape: f32[1,96], index: 4, kind: input, shape index: {}]   ;;  %s818_s5 = inlined_call_operand.vmem [shape: bf16[2,8,32], index: 5, kind: output, shape index: {0}]   ;;  %s819_s6 = inlined_call_operand.vmem [shape: bf16[2,8,32], index: 6, kind: output, shape index: {1}]   ;;  %s820_s7 = inlined_call_operand.vmem [shape: bf16[2,8,32], index: 7, kind: output, shape index: {2}]  }
   0x1   :  { %s756_s26 = smov 0  }
   0x2 LB: > { %s30_s27 = sadd.s32 1, %s702_s25  ;;  %p624_p0 = scmp.ge.s32.totalorder %s706_s26, 1  ;;  %s706_s26 = sphi %s756_s26, %s18_s26   ;;  %s702_s25 = sphi %s754_s25, %s822_s25   ;;  %s698_s24 = sphi %s752_s24, %s821_s24  }
   0x3   : > { %p32_p1 = scmp.ge.s32.totalorder %s30_s27, 2  ;;  %p264_p2 = scmp.lt.s32.totalorder %s706_s26, 3 }
   0x5   : > { %s824_s27 = smov (%p32_p1, %s30_s27), 0  ;;  %p265_p3 = pnand %p624_p0, %p264_p2 }
   0x6   : > { %p314_p4 = scmp.lt.s32.totalorder (!%p265_p3), %s698_s24, 1  ;;  %vm346_vm0 = vcmask (!%p265_p3), 261120   ;;  %v678_v7 = vld [vmem:[%s816_s3] sm:$0xff] (!%p265_p3)   ;;  %v708_v8 = vmov (!%p265_p3), 0.0   ;;  %vm709_vm1 = vmmov (!%p265_p3), 0   ;;  %v679_v9 = vld [vmem:[%s816_s3 + $0x8] sm:$0xff] (!%p265_p3)  }
   0x7   : > { %268 = sbr.rel (%p265_p3) target bundleno = 682 (0x2aa), region = 40  ;;  %642 = vmatprep.subr.bf16.mxu0 (!%p265_p3), %v708_v8  ;;  %646 = vmatprep.mubr.msk.bf16.mxu0 (!%p265_p3), %vm709_vm1, %v708_v8  ;;  %v629_v18 = vld [vmem:[%s814_s1] ss:$0 sm:$0xff] (!%p265_p3)  ;;  %vm451_vm4 = vcmask (!%p265_p3), 257024   ;;  %s710_s23 = smov (!%p265_p3), 96  }
   0x8   : > { %643 = vmatpush3.bf16.msra.mxu0 (!%p265_p3), %v678_v7  ;;  %v630_v21 = vld [vmem:[%s815_s2] ss:$0 sm:$0xff] (!%p265_p3) }
   0x9   : > { %644 = vmatprep.subr.bf16.mxu0 (!%p265_p3), %v708_v8  ;;  %v631_v25 = vld [vmem:[%s817_s4] ss:$0 sm:$0xff] (!%p265_p3) }
   0xc   : > { %645 = vmatpush3.bf16.msra.mxu0 (!%p265_p3), %v679_v9 }
   0xe   : > { %s826_s24 = smov (!%p314_p4, %s698_s24), 1 }
   0xf   : > { %s625_s28 = sshll.u32 %s826_s24, 3  ;;  %s626_s19 = sshll.u32 %s826_s24, 2 }
  0x10   : > { %s320_s8 = scalar_lea.vmem %s813_s0, %s625_s28  ;;  %s327_s22 = scalar_lea.vmem %s818_s5, %s626_s19 }
  0x11   : > { %v343_v0 = vld [vmem:[%s320_s8] sm:$0xff]  ;;  %s711_s28 = smov 64   ;;  %s334_s24 = scalar_lea.vmem %s819_s6, %s626_s19 }
  0x12   : > { %v347_v1 = vsel %vm346_vm0, %v343_v0, 0.0  ;;  %s341_s10 = scalar_lea.vmem %s820_s7, %s626_s19 }
  0x13   : > { %348 = vadd.xlane.f32.xlu0 %v347_v1 }
  0xa0   : > { %v349_v2 = vpop.xlane.xlu0 %348 }
  0xa1   : > { %v351_v3 = vmul.f32 0.03125, %v349_v2 }
  0xa3   : > { %v352_v4 = vsub.f32 %v343_v0, %v351_v3 }
  0xa5   : > { %v353_v5 = vmul.f32 %v352_v4, %v352_v4  ;;  %v365_v19 = vmul.f32 %v629_v18, %v352_v4 }
  0xa7   : > { %v354_v6 = vsel %vm346_vm0, %v353_v5, 0.0 }
  0xa8   : > { %355 = vadd.xlane.f32.xlu0 %v354_v6 }
 0x135   : > { %v356_v10 = vpop.xlane.xlu0 %355 }
 0x136   : > { %v358_v11 = vmul.f32 0.032258064, %v356_v10 }
 0x138   : > { %680 = vrsqrt.f32 %v358_v11  ;;  %vm368_vm2 = vcmp.eq.f32.partialorder %v358_v11, inf  ;;  %v371_v14 = vand.u32 2147483648, %v358_v11  ;;  %vm370_vm3 = vcmp.eq.f32.partialorder %v358_v11, 0.0 }
 0x142   : > { %v681_v12 = vpop.eup %680 }
 0x143   : > { %v367_v13 = vmul.f32 %v681_v12, %v358_v11 }
 0x145   : > { %v369_v15 = vsel %vm368_vm2, %v358_v11, %v367_v13 }
 0x146   : > { %v372_v16 = vsel %vm370_vm3, %v371_v14, %v369_v15 }
 0x147   : > { %v373_v17 = vadd.f32 1e-06, %v372_v16 }
 0x149   : > { %682 = vrcp.f32 %v373_v17 }
 0x153   : > { %v683_v20 = vpop.eup %682 }
 0x154   : > { %v375_v22 = vmul.f32 %v683_v20, %v365_v19 }
 0x156   : > { %v382_v23 = vadd.f32 %v630_v21, %v375_v22 }
 0x158   : > { %v383_v24 = vpack.c.bf16 %v382_v23, %v382_v23 }
 0x15a   : > { %647 = vmatmul.mubr.msk.bf16.vlgmr.msra.gmra.mrb[0].mxu0 %vm346_vm0, %v383_v24 }
 0x22d   : > { %v444_v26 = vpop.f32.mrb[0].mxu0 }
 0x22e   : > { %v445_v27 = vadd.f32 %v631_v25, %v444_v26  ;;  %v648_v28 = vpop.f32.mrb[1].mxu0 }
 0x22f   : > { %v447_v29 = vpop.f32.mrb[2].mxu0 }
 0x230   : > { %v450_v30 = vpack.c.bf16 %v445_v27, %v445_v27  ;;  %v649_v31 = vpop.f32.mrb[3].mxu0 }
 0x232   : > { %456 = vrot.lane.b32.xlu1 %v450_v30, %s710_s23  ;;  %452 = vst.msk [vmem:[%s327_s22] sm:$0xf] %vm451_vm4, %v450_v30 }
 0x236   : > { %460 = vrot.lane.b32.xlu1 %v450_v30, %s711_s28 }
 0x2a4   : > { %v457_v32 = vpop.permute.xlu1 %456 }
 0x2a5   : > { %459 = vst.msk [vmem:[%s334_s24] sm:$0xf] %vm451_vm4, %v457_v32 }
 0x2a8   : > { %v461_v33 = vpop.permute.xlu1 %460 }
 0x2a9   : > { %463 = vst.msk [vmem:[%s341_s10] sm:$0xf] %vm451_vm4, %v461_v33 }
 0x2aa PF: > { %s18_s26 = sadd.s32 1, %s706_s26   ;;  %s821_s24 = smov %s702_s25 }
 0x2ab   : > { %p15_p5 = scmp.ge.s32.totalorder %s18_s26, 4   ;;  %s822_s25 = smov %s824_s27 }
 0x2ad   :  { %17 = sbr.rel (!%p15_p5) target bundleno = 2 (0x2), region = 94 }

// kernel: bert_forward.8
= control target key start
LH: loop header
LB: loop body
LE: loop exit
PB: predicated region body
PF: predicated region fallthrough
CT: control target
= control target key end

     0   :  { %s1050_s15 = smov 0   ;;  %s1052_s16 = smov 0   ;;  %s1170_s0 = inlined_call_operand.vmem [shape: f32[2,1,8], index: 0, kind: input, shape index: {}]   ;;  %s1171_s1 = inlined_call_operand.vmem [shape: bf16[2,8,32], index: 1, kind: input, shape index: {}]   ;;  %s1172_s2 = inlined_call_operand.vmem [shape: bf16[2,8,32], index: 2, kind: input, shape index: {}]   ;;  %s1173_s3 = inlined_call_operand.vmem [shape: bf16[2,8,32], index: 3, kind: input, shape index: {}]   ;;  %s1174_s4 = inlined_call_operand.vmem [shape: bf16[2,8,32], index: 4, kind: output, shape index: {}]  }
   0x1   :  { %s1054_s17 = smov 0  }
   0x2 LB: > { %s26_s18 = sadd.s32 1, %s1011_s16  ;;  %p859_p0 = scmp.ge.s32.totalorder %s1015_s17, 1  ;;  %s1015_s17 = sphi %s1054_s17, %s14_s17   ;;  %s1011_s16 = sphi %s1052_s16, %s1176_s16   ;;  %s1007_s15 = sphi %s1050_s15, %s1175_s15  }
   0x3   : > { %p28_p1 = scmp.ge.s32.totalorder %s26_s18, 2  ;;  %p206_p2 = scmp.lt.s32.totalorder %s1015_s17, 3 }
   0x5   : > { %s1178_s18 = smov (%p28_p1, %s26_s18), 0  ;;  %p207_p3 = pnand %p859_p0, %p206_p2 }
   0x6   : > { %p247_p4 = scmp.lt.s32.totalorder (!%p207_p3), %s1007_s15, 1  ;;  %v1017_v0 = vmov (!%p207_p3), 0.0   ;;  %vm1018_vm0 = vmmov (!%p207_p3), 0   ;;  %vm283_vm1 = vcmask (!%p207_p3), 64512   ;;  %s1019_s29 = smov (!%p207_p3), 120   ;;  %vm345_vm2 = vcmask (!%p207_p3), 1043456  }
   0x7   : > { %210 = sbr.rel (%p207_p3) target bundleno = 1478 (0x5c6), region = 36  ;;  %894 = vmatprep.subr.bf16.mxu0 (!%p207_p3), %v1017_v0  ;;  %896 = vmatprep.mubr.msk.bf16.mxu0 (!%p207_p3), %vm1018_vm0, %v1017_v0  ;;  %s1020_s30 = smov (!%p207_p3), 112   ;;  %vm741_vm3 = vcmask (!%p207_p3), 130048   ;;  %vm743_vm4 = vcmask (!%p207_p3), 195584   ;;  %vm746_vm5 = vcmask (!%p207_p3), 257024  }
   0x8   : > { %900 = vmatprep.subr.bf16.mxu1 (!%p207_p3), %v1017_v0  ;;  %902 = vmatprep.mubr.msk.bf16.mxu1 (!%p207_p3), %vm1018_vm0, %v1017_v0  ;;  %s1021_s5 = smov (!%p207_p3), 104   ;;  %s1022_s9 = smov (!%p207_p3), 8  }
   0x9   : > { %s1023_s10 = smov (!%p207_p3), 16   ;;  %s1024_s11 = smov (!%p207_p3), 24  }
   0xe   : > { %s1180_s15 = smov (!%p247_p4, %s1007_s15), 1 }
   0xf   : > { %s1074_s19 = sshll.u32 %s1180_s15, 2  ;;  %s249_s28 = scalar_lea.vmem %s1170_s0, %s1180_s15 }
  0x10   : > { %s260_s22 = scalar_lea.vmem %s1172_s2, %s1074_s19  ;;  %s256_s25 = scalar_lea.vmem %s1171_s1, %s1074_s19  ;;  %v1092_v4 = vld [vmem:[%s249_s28] ss:$0 sm:$0xff] }
  0x11   : > { %v274_v1 = vld [vmem:[%s260_s22] sm:$0xf]  ;;  %s264_s8 = scalar_lea.vmem %s1173_s3, %s1074_s19  ;;  %s271_s14 = scalar_lea.vmem %s1174_s4, %s1074_s19 }
  0x12   : > { %v288_v2 = vsel %vm283_vm1, %v274_v1, 0  ;;  %v273_v3 = vld [vmem:[%s256_s25] sm:$0xf]  ;;  %v868_v11 = vcombine.low %v274_v1, %v274_v1 }
  0x13   : > { %895 = vmatpush3.bf16.xpose.msra.mxu0 %v288_v2  ;;  %v867_v12 = vcombine.low %v273_v3, %v273_v3  ;;  %v1106_v18 = vld [vmem:[%s264_s8] sm:$0xf] }
  0x14   : > { %912 = vmatprep.subr.bf16.mxu0 %v1017_v0  ;;  %397 = vrot.lane.b32.xlu1 %v868_v11, %s1019_s29  ;;  %v347_v19 = vsel %vm345_vm2, %v1106_v18, 0  ;;  %v870_v2 = vcombine.low %v1106_v18, %v1106_v18 }
  0x15   : > { %901 = vmatpush3.bf16.msra.mxu1 %v347_v19 }
  0x16   : > { %906 = vmatprep.subr.bf16.mxu1 %v1017_v0 }
  0x18   : > { %392 = vrot.lane.b32.xlu1 %v867_v12, %s1019_s29 }
  0x1a   : > { %897 = vmatmul.mubr.msk.bf16.vlgmr.msra.gmra.mrb[0].mxu0 %vm283_vm1, %v273_v3 }
  0x1b   : > { %914 = vmatprep.mubr.msk.bf16.mxu0 %vm1018_vm0, %v1017_v0 }
  0x1c   : > { %508 = vrot.lane.b32.xlu1 %v867_v12, %s1020_s30 }
  0x20   : > { %620 = vrot.lane.b32.xlu1 %v868_v11, %s1021_s5 }
  0x24   : > { %618 = vrot.lane.b32.xlu1 %v867_v12, %s1021_s5 }
  0x86   : > { %v398_v22 = vpop.permute.xlu1 %397 }
  0x87   : > { %v403_v24 = vsel %vm283_vm1, %v398_v22, 0 }
  0x8a   : > { %v393_v26 = vpop.permute.xlu1 %392 }
  0x8e   : > { %v509_v28 = vpop.permute.xlu1 %508 }
  0x92   : > { %v621_v30 = vpop.permute.xlu1 %620 }
  0x93   : > { %v626_v31 = vsel %vm283_vm1, %v621_v30, 0 }
  0x96   : > { %v619_v32 = vpop.permute.xlu1 %618 }
  0xed   : > { %v324_v5 = vpop.f32.mrb[0].mxu0 }
  0xee   : > { %v325_v6 = vadd.f32 %v1092_v4, %v324_v5  ;;  %v898_v7 = vpop.f32.mrb[1].mxu0 }
  0xef   : > { %v327_v8 = vpop.f32.mrb[2].mxu0 }
  0xf0   : > { %v899_v9 = vpop.f32.mrb[3].mxu0  ;;  %v330_v10 = vsel %vm283_vm1, %v325_v6, -inf }
  0xf1   : > { %331 = vmax.xlane.f32.xlu0 %v330_v10 }
 0x17e   : > { %v332_v13 = vpop.xlane.xlu0 %331 }
 0x17f   : > { %v333_v14 = vsub.f32 %v325_v6, %v332_v13 }
 0x181   : > { %v334_v15 = vmul.f32 1.442695, %v333_v14 }
 0x183   : > { %977 = vpow2.f32 %v334_v15 }
 0x18d   : > { %v978_v16 = vpop.eup %977 }
 0x18e   : > { %v336_v17 = vsel %vm283_vm1, %v978_v16, 0.0 }
 0x18f   : > { %337 = vadd.xlane.f32.xlu0 %v336_v17 }
 0x1a5   : > { %510 = vrot.lane.b32.xlu0 %v868_v11, %s1020_s30 }
 0x21c   : > { %v338_v20 = vpop.xlane.xlu0 %337 }
 0x21d   : > { %979 = vrcp.f32 %v338_v20 }
 0x220   : > { %v511_v27 = vpop.permute.xlu0 %510 }
 0x221   : > { %v516_v29 = vsel %vm283_vm1, %v511_v27, 0 }
 0x227   : > { %v980_v21 = vpop.eup %979 }
 0x228   : > { %v340_v23 = vmul.f32 %v980_v21, %v978_v16 }
 0x22a   : > { %v341_v25 = vpack.c.bf16 %v340_v23, %v340_v23 }
 0x22c   : > { %903 = vmatmul.mubr.msk.bf16.vlgmr.msra.gmra.mrb[0].mxu1 %vm283_vm1, %v341_v25 }
 0x22d   : > { %907 = vmatpush3.bf16.xpose.msra.mxu1 %v403_v24  ;;  %908 = vmatprep.mubr.msk.bf16.mxu1 %vm1018_vm0, %v1017_v0 }
 0x22e   : > { %918 = vmatprep.subr.bf16.mxu1 %v1017_v0 }
 0x234   : > { %909 = vmatmul.mubr.msk.bf16.vlgmr.msra.gmra.mrb[4].mxu1 %vm283_vm1, %v393_v26 }
 0x235   : > { %919 = vmatpush3.bf16.xpose.msra.mxu1 %v516_v29  ;;  %920 = vmatprep.mubr.msk.bf16.mxu1 %vm1018_vm0, %v1017_v0 }
 0x236   : > { %930 = vmatprep.subr.bf16.mxu1 %v1017_v0 }
 0x23c   : > { %921 = vmatmul.mubr.msk.bf16.vlgmr.msra.gmra.mrb[8].mxu1 %vm283_vm1, %v509_v28 }
 0x23d   : > { %931 = vmatpush3.bf16.xpose.msra.mxu1 %v626_v31  ;;  %932 = vmatprep.mubr.msk.bf16.mxu1 %vm1018_vm0, %v1017_v0 }
 0x244   : > { %933 = vmatmul.mubr.msk.bf16.vlgmr.msra.gmra.mrb[12].mxu1 %vm283_vm1, %v619_v32 }
 0x2ff   : > { %v1127_v33 = vpop.f32.mrb[0].mxu1 }
 0x300   : > { %v904_v34 = vpop.f32.mrb[1].mxu1 }
 0x301   : > { %v386_v35 = vpop.f32.mrb[2].mxu1 }
 0x302   : > { %v905_v36 = vpop.f32.mrb[3].mxu1 }
 0x307   : > { %v439_v37 = vpop.f32.mrb[4].mxu1 }
 0x308   : > { %v440_v38 = vadd.f32 %v1092_v4, %v439_v37  ;;  %v910_v39 = vpop.f32.mrb[5].mxu1 }
 0x309   : > { %v442_v40 = vpop.f32.mrb[6].mxu1 }
 0x30a   : > { %v911_v41 = vpop.f32.mrb[7].mxu1  ;;  %v445_v42 = vsel %vm283_vm1, %v440_v38, -inf }
 0x30b   : > { %446 = vmax.xlane.f32.xlu1 %v445_v42 }
 0x30f   : > { %v552_v43 = vpop.f32.mrb[8].mxu1 }
 0x310   : > { %v553_v44 = vadd.f32 %v1092_v4, %v552_v43  ;;  %v922_v45 = vpop.f32.mrb[9].mxu1 }
 0x311   : > { %v555_v46 = vpop.f32.mrb[10].mxu1 }
 0x312   : > { %v558_v47 = vsel %vm283_vm1, %v553_v44, -inf  ;;  %v923_v48 = vpop.f32.mrb[11].mxu1 }
 0x313   : > { %559 = vmax.xlane.f32.xlu0 %v558_v47 }
 0x317   : > { %v662_v49 = vpop.f32.mrb[12].mxu1 }
 0x318   : > { %v663_v50 = vadd.f32 %v1092_v4, %v662_v49  ;;  %v934_v51 = vpop.f32.mrb[13].mxu1 }
 0x319   : > { %v665_v52 = vpop.f32.mrb[14].mxu1 }
 0x31a   : > { %v668_v53 = vsel %vm283_vm1, %v663_v50, -inf  ;;  %v935_v54 = vpop.f32.mrb[15].mxu1 }
 0x31b   : > { %669 = vmax.xlane.f32.xlu1 %v668_v53 }
 0x398   : > { %v447_v55 = vpop.xlane.xlu1 %446 }
 0x399   : > { %v448_v56 = vsub.f32 %v440_v38, %v447_v55 }
 0x39b   : > { %v449_v57 = vmul.f32 1.442695, %v448_v56 }
 0x39d   : > { %981 = vpow2.f32 %v449_v57 }
 0x3a0   : > { %v560_v58 = vpop.xlane.xlu0 %559 }
 0x3a1   : > { %v561_v59 = vsub.f32 %v553_v44, %v560_v58 }
 0x3a3   : > { %v562_v60 = vmul.f32 1.442695, %v561_v59 }
 0x3a5   : > { %983 = vpow2.f32 %v562_v60 }
 0x3a7   : > { %v982_v61 = vpop.eup %981 }
 0x3a8   : > { %v451_v62 = vsel %vm283_vm1, %v982_v61, 0.0  ;;  %v670_v3 = vpop.xlane.xlu1 %669 }
 0x3a9   : > { %452 = vadd.xlane.f32.xlu1 %v451_v62  ;;  %v671_v4 = vsub.f32 %v663_v50, %v670_v3 }
 0x3ab   : > { %v672_v5 = vmul.f32 1.442695, %v671_v4 }
 0x3ad   : > { %985 = vpow2.f32 %v672_v5 }
 0x3af   : > { %v984_v63 = vpop.eup %983 }
 0x3b0   : > { %v564_v1 = vsel %vm283_vm1, %v984_v63, 0.0 }
 0x3b1   : > { %565 = vadd.xlane.f32.xlu0 %v564_v1 }
 0x3b7   : > { %v986_v6 = vpop.eup %985 }
 0x3b8   : > { %v674_v7 = vsel %vm283_vm1, %v986_v6, 0.0 }
 0x3ba   : > { %570 = vrot.lane.b32.xlu1 %v870_v2, %s1020_s30 }
 0x3c7   : > { %460 = vrot.lane.b32.xlu0 %v870_v2, %s1019_s29 }
 0x3de   : > { %675 = vadd.xlane.f32.xlu1 %v674_v7 }
 0x3ef   : > { %680 = vrot.lane.b32.xlu1 %v870_v2, %s1021_s5 }
 0x436   : > { %v453_v8 = vpop.xlane.xlu1 %452 }
 0x437   : > { %987 = vrcp.f32 %v453_v8 }
 0x43a   : > { %v571_v14 = vpop.permute.xlu1 %570 }
 0x43b   : > { %v576_v16 = vsel %vm345_vm2, %v571_v14, 0 }
 0x43e   : > { %v566_v9 = vpop.xlane.xlu0 %565 }
 0x43f   : > { %989 = vrcp.f32 %v566_v9 }
 0x441   : > { %v988_v10 = vpop.eup %987 }
 0x442   : > { %v455_v11 = vmul.f32 %v988_v10, %v982_v61  ;;  %v461_v12 = vpop.permute.xlu0 %460 }
 0x443   : > { %v466_v13 = vsel %vm345_vm2, %v461_v12, 0 }
 0x444   : > { %913 = vmatpush3.bf16.msra.mxu0 %v466_v13  ;;  %v456_v15 = vpack.c.bf16 %v455_v11, %v455_v11 }
 0x445   : > { %924 = vmatprep.subr.bf16.mxu0 %v1017_v0 }
 0x447   : > { %915 = vmatmul.mubr.msk.bf16.vlgmr.msra.gmra.mrb[4].mxu0 %vm283_vm1, %v456_v15 }
 0x448   : > { %925 = vmatpush3.bf16.msra.mxu0 %v576_v16  ;;  %926 = vmatprep.mubr.msk.bf16.mxu0 %vm1018_vm0, %v1017_v0 }
 0x449   : > { %v990_v17 = vpop.eup %989  ;;  %936 = vmatprep.subr.bf16.mxu0 %v1017_v0 }
 0x44a   : > { %v568_v18 = vmul.f32 %v990_v17, %v984_v63 }
 0x44c   : > { %v569_v19 = vpack.c.bf16 %v568_v18, %v568_v18 }
 0x44f   : > { %927 = vmatmul.mubr.msk.bf16.vlgmr.msra.gmra.mrb[8].mxu0 %vm283_vm1, %v569_v19 }
 0x450   : > { %938 = vmatprep.mubr.msk.bf16.mxu0 %vm1018_vm0, %v1017_v0 }
 0x46b   : > { %v676_v20 = vpop.xlane.xlu1 %675 }
 0x46c   : > { %991 = vrcp.f32 %v676_v20 }
 0x46f   : > { %v681_v21 = vpop.permute.xlu1 %680 }
 0x470   : > { %v686_v22 = vsel %vm345_vm2, %v681_v21, 0 }
 0x471   : > { %937 = vmatpush3.bf16.msra.mxu0 %v686_v22 }
 0x476   : > { %v992_v23 = vpop.eup %991 }
 0x477   : > { %v678_v24 = vmul.f32 %v992_v23, %v986_v6 }
 0x479   : > { %v679_v25 = vpack.c.bf16 %v678_v24, %v678_v24 }
 0x47b   : > { %939 = vmatmul.mubr.msk.bf16.vlgmr.msra.gmra.mrb[12].mxu0 %vm283_vm1, %v679_v25 }
 0x51a   : > { %v502_v26 = vpop.f32.mrb[4].mxu0 }
 0x51b   : > { %729 = vrot.lane.b32.xlu0 %v502_v26, %s1022_s9  ;;  %v916_v27 = vpop.f32.mrb[5].mxu0 }
 0x51c   : > { %v505_v28 = vpop.f32.mrb[6].mxu0 }
 0x51d   : > { %v917_v29 = vpop.f32.mrb[7].mxu0 }
 0x522   : > { %v612_v30 = vpop.f32.mrb[8].mxu0 }
 0x523   : > { %733 = vrot.lane.b32.xlu1 %v612_v30, %s1023_s10  ;;  %v928_v0 = vpop.f32.mrb[9].mxu0 }
 0x524   : > { %v615_v31 = vpop.f32.mrb[10].mxu0 }
 0x525   : > { %v929_v32 = vpop.f32.mrb[11].mxu0 }
 0x54e   : > { %v722_v34 = vpop.f32.mrb[12].mxu0 }
 0x54f   : > { %737 = vrot.lane.b32.xlu0 %v722_v34, %s1024_s11  ;;  %v940_v35 = vpop.f32.mrb[13].mxu0 }
 0x550   : > { %v725_v36 = vpop.f32.mrb[14].mxu0 }
 0x551   : > { %v941_v37 = vpop.f32.mrb[15].mxu0 }
 0x58d   : > { %v730_v38 = vpop.permute.xlu0 %729 }
 0x58e   : > { %v740_v40 = vsel %vm283_vm1, %v1127_v33, %v730_v38 }
 0x595   : > { %v734_v39 = vpop.permute.xlu1 %733 }
 0x596   : > { %v742_v41 = vsel %vm741_vm3, %v740_v40, %v734_v39 }
 0x5c1   : > { %v738_v42 = vpop.permute.xlu0 %737 }
 0x5c2   : > { %v744_v43 = vsel %vm743_vm4, %v742_v41, %v738_v42 }
 0x5c3   : > { %v745_v44 = vpack.c.bf16 %v744_v43, %v744_v43 }
 0x5c5   : > { %747 = vst.msk [vmem:[%s271_s14] sm:$0xf] %vm746_vm5, %v745_v44 }
 0x5c6 PF: > { %s14_s17 = sadd.s32 1, %s1015_s17   ;;  %s1175_s15 = smov %s1011_s16 }
 0x5c7   : > { %p11_p5 = scmp.ge.s32.totalorder %s14_s17, 4   ;;  %s1176_s16 = smov %s1178_s18 }
 0x5c9   :  { %13 = sbr.rel (!%p11_p5) target bundleno = 2 (0x2), region = 75 }

// kernel: bert_forward.9
= control target key start
LH: loop header
LB: loop body
LE: loop exit
PB: predicated region body
PF: predicated region fallthrough
CT: control target
= control target key end

     0   :  { %s950_s13 = smov 0   ;;  %s952_s14 = smov 0   ;;  %s1049_s0 = inlined_call_operand.vmem [shape: f32[2,8,32], index: 0, kind: input, shape index: {}, may-alias: {0,10}]   ;;  %s1050_s1 = inlined_call_operand.vmem [shape: bf16[2,8,32], index: 1, kind: input, shape index: {}]   ;;  %s1051_s2 = inlined_call_operand.vmem [shape: bf16[32,32], index: 2, kind: input, shape index: {}]   ;;  %s1052_s3 = inlined_call_operand.vmem [shape: f32[1,32], index: 3, kind: input, shape index: {}]   ;;  %s1053_s4 = inlined_call_operand.vmem [shape: f32[1,32], index: 4, kind: input, shape index: {}]   ;;  %s1054_s5 = inlined_call_operand.vmem [shape: f32[1,32], index: 5, kind: input, shape index: {}]   ;;  %s1055_s6 = inlined_call_operand.vmem [shape: bf16[32,64], index: 6, kind: input, shape index: {}]   ;;  %s1056_s7 = inlined_call_operand.vmem [shape: f32[1,64], index: 7, kind: input, shape index: {}]   ;;  %s1057_s8 = inlined_call_operand.vmem [shape: bf16[64,32], index: 8, kind: input, shape index: {}]   ;;  %s1058_s9 = inlined_call_operand.vmem [shape: f32[1,32], index: 9, kind: input, shape index: {}]   ;;  %s1059_s10 = inlined_call_operand.vmem [shape: f32[2,8,32], index: 10, kind: output, shape index: {}, may-alias: {0,10}]  }
   0x1   :  { %s954_s15 = smov 0  }
   0x2 LB: > { %s32_s16 = sadd.s32 1, %s887_s14  ;;  %p770_p0 = scmp.ge.s32.totalorder %s891_s15, 1  ;;  %s891_s15 = sphi %s954_s15, %s20_s15   ;;  %s887_s14 = sphi %s952_s14, %s1061_s14   ;;  %s883_s13 = sphi %s950_s13, %s1060_s13  }
   0x3   : > { %p34_p1 = scmp.ge.s32.totalorder %s32_s16, 2  ;;  %p344_p2 = scmp.lt.s32.totalorder %s891_s15, 3 }
   0x5   : > { %s1063_s16 = smov (%p34_p1, %s32_s16), 0  ;;  %p345_p3 = pnand %p770_p0, %p344_p2 }
   0x6   : > { %v857_v0 = vld [vmem:[%s1051_s2] sm:$0xff] (!%p345_p3)   ;;  %v893_v1 = vmov (!%p345_p3), 0.0   ;;  %v858_v2 = vld [vmem:[%s1051_s2 + $0x8] sm:$0xff] (!%p345_p3)   ;;  %vm894_vm0 = vmmov (!%p345_p3), 0   ;;  %p393_p4 = scmp.lt.s32.totalorder (!%p345_p3), %s883_s13, 1  ;;  %vm440_vm1 = vcmask (!%p345_p3), 261120  }
   0x7   : > { %348 = sbr.rel (%p345_p3) target bundleno = 997 (0x3e5), region = 60  ;;  %803 = vmatprep.subr.bf16.mxu1 (!%p345_p3), %v893_v1  ;;  %819 = vmatprep.subr.bf16.mxu0 (!%p345_p3), %v893_v1  ;;  %v774_v4 = vld [vmem:[%s1052_s3] ss:$0 sm:$0xff] (!%p345_p3)  ;;  %v860_v19 = vld [vmem:[%s1055_s6 + $0x8] sm:$0xff] (!%p345_p3)   ;;  %v863_v37 = vld [vmem:[%s1057_s8 + $0x10] sm:$0xff] (!%p345_p3)   ;;  %vm631_vm4 = vcmask (!%p345_p3), 523264  }
   0x8   : > { %804 = vmatpush3.bf16.msra.mxu1 (!%p345_p3), %v857_v0  ;;  %807 = vmatprep.mubr.msk.bf16.mxu1 (!%p345_p3), %vm894_vm0, %v893_v1  ;;  %v859_v18 = vld [vmem:[%s1055_s6] sm:$0xff] (!%p345_p3)   ;;  %v862_v21 = vld [vmem:[%s1057_s8 + $0x8] sm:$0xff] (!%p345_p3)   ;;  %v864_v38 = vld [vmem:[%s1057_s8 + $0x18] sm:$0xff] (!%p345_p3)  }
   0x9   : > { %805 = vmatprep.subr.bf16.mxu1 (!%p345_p3), %v893_v1  ;;  %827 = vmatprep.mubr.msk.bf16.mxu0 (!%p345_p3), %vm894_vm0, %v893_v1  ;;  %v861_v20 = vld [vmem:[%s1057_s8] sm:$0xff] (!%p345_p3)  }
   0xa   : > { %820 = vmatpush3.bf16.msra.mxu0 (!%p345_p3), %v861_v20  ;;  %v778_v30 = vld [vmem:[%s1053_s4] ss:$0 sm:$0xff] (!%p345_p3) }
   0xb   : > { %821 = vmatprep.subr.bf16.mxu0 (!%p345_p3), %v893_v1  ;;  %v779_v33 = vld [vmem:[%s1054_s5] ss:$0 sm:$0xff] (!%p345_p3) }
   0xc   : > { %806 = vmatpush3.bf16.msra.mxu1 (!%p345_p3), %v858_v2  ;;  %v780_v39 = vld [vmem:[%s1056_s7] ss:$0 sm:$0xff] (!%p345_p3) }
   0xd   : > { %811 = vmatprep.subr.bf16.mxu1 (!%p345_p3), %v893_v1  ;;  %v784_v47 = vld [vmem:[%s1058_s9] ss:$0 sm:$0xff] (!%p345_p3) }
   0xe   : > { %s1065_s13 = smov (!%p393_p4, %s883_s13), 1  ;;  %822 = vmatpush3.bf16.msra.mxu0 %v862_v21 }
   0xf   : > { %s772_s21 = sshll.u32 %s1065_s13, 2  ;;  %s771_s25 = sshll.u32 %s1065_s13, 3  ;;  %823 = vmatprep.subr.bf16.mxu0 %v893_v1 }
  0x10   : > { %s406_s24 = scalar_lea.vmem %s1050_s1, %s772_s21  ;;  %s399_s28 = scalar_lea.vmem %s1049_s0, %s771_s25 }
  0x11   : > { %v416_v3 = vld [vmem:[%s406_s24] sm:$0xf]  ;;  %s413_s22 = scalar_lea.vmem %s1059_s10, %s771_s25 }
  0x12   : > { %808 = vmatmul.mubr.msk.bf16.vlgmr.msra.gmra.mrb[0].mxu1 %vm440_vm1, %v416_v3  ;;  %v415_v5 = vld [vmem:[%s399_s28] sm:$0xff]  ;;  %824 = vmatpush3.bf16.msra.mxu0 %v863_v37 }
  0x13   : > { %815 = vmatprep.mubr.msk.bf16.mxu1 %vm894_vm0, %v893_v1  ;;  %812 = vmatpush3.bf16.msra.mxu1 %v859_v18 }
  0x14   : > { %813 = vmatprep.subr.bf16.mxu1 %v893_v1  ;;  %825 = vmatprep.subr.bf16.mxu0 %v893_v1 }
  0x16   : > { %826 = vmatpush3.bf16.msra.mxu0 %v864_v38 }
  0x17   : > { %814 = vmatpush3.bf16.msra.mxu1 %v860_v19 }
  0xe5   : > { %v478_v6 = vpop.f32.mrb[0].mxu1 }
  0xe6   : > { %v479_v7 = vadd.f32 %v774_v4, %v478_v6  ;;  %v809_v8 = vpop.f32.mrb[1].mxu1 }
  0xe7   : > { %v481_v9 = vpop.f32.mrb[2].mxu1 }
  0xe8   : > { %v484_v10 = vadd.f32 %v479_v7, %v415_v5  ;;  %v810_v11 = vpop.f32.mrb[3].mxu1 }
  0xea   : > { %v487_v12 = vsel %vm440_vm1, %v484_v10, 0.0 }
  0xeb   : > { %488 = vadd.xlane.f32.xlu0 %v487_v12 }
 0x178   : > { %v489_v13 = vpop.xlane.xlu0 %488 }
 0x179   : > { %v491_v14 = vmul.f32 0.03125, %v489_v13 }
 0x17b   : > { %v492_v15 = vsub.f32 %v484_v10, %v491_v14 }
 0x17d   : > { %v493_v16 = vmul.f32 %v492_v15, %v492_v15  ;;  %v505_v31 = vmul.f32 %v778_v30, %v492_v15 }
 0x17f   : > { %v494_v17 = vsel %vm440_vm1, %v493_v16, 0.0 }
 0x180   : > { %495 = vadd.xlane.f32.xlu0 %v494_v17 }
 0x20d   : > { %v496_v22 = vpop.xlane.xlu0 %495 }
 0x20e   : > { %v498_v23 = vmul.f32 0.032258064, %v496_v22 }
 0x210   : > { %865 = vrsqrt.f32 %v498_v23  ;;  %vm508_vm2 = vcmp.eq.f32.partialorder %v498_v23, inf  ;;  %v511_v26 = vand.u32 2147483648, %v498_v23  ;;  %vm510_vm3 = vcmp.eq.f32.partialorder %v498_v23, 0.0 }
 0x21a   : > { %v866_v24 = vpop.eup %865 }
 0x21b   : > { %v507_v25 = vmul.f32 %v866_v24, %v498_v23 }
 0x21d   : > { %v509_v27 = vsel %vm508_vm2, %v498_v23, %v507_v25 }
 0x21e   : > { %v512_v28 = vsel %vm510_vm3, %v511_v26, %v509_v27 }
 0x21f   : > { %v513_v29 = vadd.f32 1e-06, %v512_v28 }
 0x221   : > { %867 = vrcp.f32 %v513_v29 }
 0x22b   : > { %v868_v32 = vpop.eup %867 }
 0x22c   : > { %v515_v34 = vmul.f32 %v868_v32, %v505_v31 }
 0x22e   : > { %v522_v35 = vadd.f32 %v779_v33, %v515_v34 }
 0x230   : > { %v523_v36 = vpack.c.bf16 %v522_v35, %v522_v35 }
 0x232   : > { %816 = vmatmul.mubr.msk.bf16.vlgmr.msra.gmra.mrb[4].mxu1 %vm440_vm1, %v523_v36 }
 0x305   : > { %v584_v40 = vpop.f32.mrb[4].mxu1 }
 0x306   : > { %v585_v41 = vadd.f32 %v780_v39, %v584_v40  ;;  %v817_v42 = vpop.f32.mrb[5].mxu1 }
 0x307   : > { %v587_v43 = vpop.f32.mrb[6].mxu1 }
 0x308   : > { %v590_v44 = vmax.f32 %v585_v41, 0.0  ;;  %v818_v45 = vpop.f32.mrb[7].mxu1 }
 0x30a   : > { %v591_v46 = vpack.c.bf16 %v590_v44, %v590_v44 }
 0x30c   : > { %828 = vmatmul.mubr.msk.bf16.vlgmr.msra.gmra.mrb[0].mxu0 %vm631_vm4, %v591_v46 }
 0x3df   : > { %v669_v48 = vpop.f32.mrb[0].mxu0 }
 0x3e0   : > { %v670_v49 = vadd.f32 %v784_v47, %v669_v48  ;;  %v829_v50 = vpop.f32.mrb[1].mxu0 }
 0x3e1   : > { %v672_v51 = vpop.f32.mrb[2].mxu0 }
 0x3e2   : > { %v675_v52 = vadd.f32 %v670_v49, %v484_v10  ;;  %v830_v53 = vpop.f32.mrb[3].mxu0 }
 0x3e4   : > { %676 = vst.msk [vmem:[%s413_s22] sm:$0xff] %vm440_vm1, %v675_v52 }
 0x3e5 PF: > { %s20_s15 = sadd.s32 1, %s891_s15   ;;  %s1060_s13 = smov %s887_s14 }
 0x3e6   : > { %p17_p5 = scmp.ge.s32.totalorder %s20_s15, 4   ;;  %s1061_s14 = smov %s1063_s16 }
 0x3e8   :  { %19 = sbr.rel (!%p17_p5) target bundleno = 2 (0x2), region = 93 }

</bundles_post_ra>
